<compile_context>
chip_gen: v7x
topology: tpu7x:2x2x1
jax: 0.10.0
libtpu: 0.0.40
codegen_flags: <defaults>
</compile_context>

<pallas_src>
import math

import jax
import jax.numpy as jnp
from jax.experimental import pallas as pl
from jax.experimental.pallas import tpu as pltpu


def _round_up(x, m):
    return ((x + m - 1) // m) * m


def _cdiv(a, b):
    return (a + b - 1) // b


_K_FULL_CAP = 1536   # largest reduction dim taken as a single full-K block
_N_FULL_CAP = 640    # largest output-channel dim taken as a single full-N block
_POOL_C_CAP = 288    # largest channel dim taken whole in the pooling kernel
_TM_CAP = 512


def _pick_lane_tile(n, full_cap):
    """Tile for a lane-mapped (last) dim: the full dim when small enough
    (lane-dense, no masked stores), else the largest 128-multiple divisor,
    else the full dim (always an exact divisor -> no partial lane blocks)."""
    if n <= full_cap:
        return n
    for t in (512, 384, 256, 128):
        if n % t == 0:
            return t
    return n


def _pick_tm(m, cap=_TM_CAP):
    """Balanced, 8-aligned tile for the (possibly ragged) M axis."""
    return min(cap, _round_up(_cdiv(m, _cdiv(m, cap)), 8))


# ----------------------------------------------------------------------------
# Pallas kernels
# ----------------------------------------------------------------------------
def _make_mm_kernel(apply_relu):
    def kernel(a_ref, b_ref, s_ref, t_ref, o_ref, acc_ref):
        @pl.when(pl.program_id(2) == 0)
        def _():
            acc_ref[...] = jnp.zeros_like(acc_ref)

        acc_ref[...] += jnp.dot(a_ref[...], b_ref[...],
                                preferred_element_type=jnp.float32)

        @pl.when(pl.program_id(2) == pl.num_programs(2) - 1)
        def _():
            y = acc_ref[...] * s_ref[...] + t_ref[...]
            if apply_relu:
                y = jnp.maximum(y, 0.0)
            o_ref[...] = y.astype(o_ref.dtype)

    return kernel


_MM_KERNEL_RELU = _make_mm_kernel(True)
_MM_KERNEL_LINEAR = _make_mm_kernel(False)


def _pool_max_kernel(x_ref, o_ref):
    o_ref[...] = jnp.max(x_ref[...], axis=0).astype(o_ref.dtype)


def _pool_avg_kernel(x_ref, o_ref):
    # count_include_pad=True semantics: divide by the full (static) window size.
    inv = 1.0 / x_ref.shape[0]
    o_ref[...] = (jnp.sum(x_ref[...].astype(jnp.float32), axis=0) * inv
                  ).astype(o_ref.dtype)


# ----------------------------------------------------------------------------
# Pallas wrappers
# ----------------------------------------------------------------------------
def fused_matmul(a, w, scale, bias, relu, out_dtype=jnp.bfloat16):
    """out = act((a @ w) * scale + bias)  with f32 MXU accumulation.

    a:     (M, K) bf16 im2col patches / activations.
    w:     (K, N) bf16 pre-transposed weights (K already padded at init).
    scale/bias: (1, N) f32 folded eval BatchNorm affine.
    K and N tiles always divide exactly; only M may have a masked boundary tile.
    """
    M, K = a.shape
    Kw, N = w.shape
    assert K == Kw, (K, Kw)
    tm = _pick_tm(M)
    tk = _pick_lane_tile(K, _K_FULL_CAP)
    tn = _pick_lane_tile(N, _N_FULL_CAP)
    nm, nn, nk = _cdiv(M, tm), N // tn, K // tk

    kernel = _MM_KERNEL_RELU if relu else _MM_KERNEL_LINEAR
    cost = pl.CostEstimate(
        flops=2 * M * N * K,
        transcendentals=0,
        bytes_accessed=int(a.size * 2 + w.size * 2 + scale.size * 8
                           + M * N * jnp.dtype(out_dtype).itemsize))

    return pl.pallas_call(
        kernel,
        out_shape=jax.ShapeDtypeStruct((M, N), out_dtype),
        grid=(nm, nn, nk),
        in_specs=[
            pl.BlockSpec((tm, tk), lambda i, j, k: (i, k)),
            pl.BlockSpec((tk, tn), lambda i, j, k: (k, j)),
            pl.BlockSpec((1, tn), lambda i, j, k: (0, j)),
            pl.BlockSpec((1, tn), lambda i, j, k: (0, j)),
        ],
        out_specs=pl.BlockSpec((tm, tn), lambda i, j, k: (i, j)),
        scratch_shapes=[pltpu.VMEM((tm, tn), jnp.float32)],
        compiler_params=pltpu.CompilerParams(
            dimension_semantics=("parallel", "parallel", "arbitrary")),
        cost_estimate=cost,
    )(a, w, scale, bias)


def _pool_reduce(arr, kind, out_dtype=jnp.bfloat16):
    """arr: (KW, M, C) -> (M, C) max or mean over the window axis (Pallas)."""
    KW, M, C = arr.shape
    tm = _pick_tm(M)
    tc = _pick_lane_tile(C, _POOL_C_CAP)
    kernel = _pool_max_kernel if kind == "max" else _pool_avg_kernel
    return pl.pallas_call(
        kernel,
        out_shape=jax.ShapeDtypeStruct((M, C), out_dtype),
        grid=(_cdiv(M, tm), C // tc),
        in_specs=[pl.BlockSpec((KW, tm, tc), lambda i, j: (0, i, j))],
        out_specs=pl.BlockSpec((tm, tc), lambda i, j: (i, j)),
        compiler_params=pltpu.CompilerParams(
            dimension_semantics=("parallel", "parallel")),
    )(arr)


# ----------------------------------------------------------------------------
# Conv / pool glue (window extraction only; all compute lives in the kernels)
# ----------------------------------------------------------------------------
def _shifted_views(x, kh, kw, sh, sw, ph, pw):
    """Return the kh*kw shifted/strided views of (padded) x, each (B,Ho,Wo,C)."""
    if ph > 0 or pw > 0:
        x = jnp.pad(x, ((0, 0), (ph, ph), (pw, pw), (0, 0)))
    B, H, W, C = x.shape
    Ho = (H - kh) // sh + 1
    Wo = (W - kw) // sw + 1
    views = []
    for dy in range(kh):
        for dx in range(kw):
            views.append(x[:, dy:dy + (Ho - 1) * sh + 1:sh,
                           dx:dx + (Wo - 1) * sw + 1:sw, :])
    return views, Ho, Wo


def _extract_patches(x, kh, kw, stride, padding, kp):
    """im2col: NHWC -> (B*Ho*Wo, kp), window-major / channel-minor columns."""
    views, Ho, Wo = _shifted_views(x, kh, kw, stride[0], stride[1],
                                   padding[0], padding[1])
    B, C = x.shape[0], x.shape[-1]
    pad = kp - kh * kw * C
    if pad > 0:
        views.append(jnp.zeros((B, Ho, Wo, pad), x.dtype))
    patches = jnp.concatenate(views, axis=-1)
    return patches.reshape(B * Ho * Wo, kp), Ho, Wo


def conv_bn_act(x, p, kh=1, kw=1, stride=(1, 1), padding=(0, 0), relu=True):
    """BasicConv2d: Conv2d(bias=False) + folded eval BatchNorm2d + ReLU."""
    wk, scale, bias = p["wk"], p["scale"], p["bias"]
    Kp, N = wk.shape
    B = x.shape[0]

    if kh == 1 and kw == 1 and stride == (1, 1) and padding == (0, 0):
        _, H, W, C = x.shape
        Ho, Wo = H, W
        a2 = x.reshape(B * H * W, C)                       # zero-copy reshape
    else:
        a2, Ho, Wo = _extract_patches(x, kh, kw, stride, padding, Kp)

    out = fused_matmul(a2, wk, scale, bias, relu=relu, out_dtype=jnp.bfloat16)
    return out.reshape(B, Ho, Wo, N)


def pool2d(x, kind, k=3, s=2, p=0):
    views, Ho, Wo = _shifted_views(x, k, k, s, s, p, p)
    B, C = x.shape[0], x.shape[-1]
    arr = jnp.stack(views, axis=0).reshape(k * k, B * Ho * Wo, C)
    return _pool_reduce(arr, kind).reshape(B, Ho, Wo, C)


def global_avg_pool(x):
    B, H, W, C = x.shape
    arr = jnp.transpose(x.reshape(B, H * W, C), (1, 0, 2))  # (HW, B, C), tiny
    return _pool_reduce(arr, "avg")                          # (B, C)


def linear(feats, p):
    a2 = feats.astype(jnp.bfloat16)
    return fused_matmul(a2, p["wk"], p["scale"], p["bias"], relu=False,
                        out_dtype=jnp.float32)


# ----------------------------------------------------------------------------
# Deterministic parameter initialization (synthetic, not a checkpoint load).
# Weights are stored kernel-ready: (Kp, cout) bf16, BN folded into (1, cout).
# ----------------------------------------------------------------------------
class ParamGen:
    def __init__(self, key):
        self.key = key
        self.i = 0

    def normal(self, shape, stddev):
        self.i += 1
        k = jax.random.fold_in(self.key, self.i)
        return stddev * jax.random.normal(k, shape, jnp.float32)


def basic_conv_params(pg, cin, cout, kh, kw):
    fan_in = cin * kh * kw
    w = pg.normal((cout, cin, kh, kw), math.sqrt(2.0 / fan_in))
    gamma = 1.0 + pg.normal((cout,), 0.05)
    beta = pg.normal((cout,), 0.05)
    running_mean = pg.normal((cout,), 0.05)
    running_var = jnp.ones((cout,), jnp.float32)
    eps = 1e-3  # BatchNorm2d(eps=0.001)
    scale = gamma / jnp.sqrt(running_var + eps)
    bias = beta - running_mean * scale

    kc = kh * kw * cin
    # Pad K only when it will be tiled, so a 128-multiple divisor always exists.
    kp = kc if kc <= _K_FULL_CAP else _round_up(kc, 128)
    wk = jnp.transpose(w, (2, 3, 1, 0)).reshape(kc, cout)   # (kh*kw*cin, cout)
    if kp != kc:
        wk = jnp.pad(wk, ((0, kp - kc), (0, 0)))
    return {"wk": wk.astype(jnp.bfloat16),
            "scale": scale.reshape(1, cout),
            "bias": bias.reshape(1, cout)}


def _fuse_1x1(*ps):
    """Concatenate parallel 1x1-conv branches along the output (N) axis."""
    return {"wk": jnp.concatenate([p["wk"] for p in ps], axis=1),
            "scale": jnp.concatenate([p["scale"] for p in ps], axis=1),
            "bias": jnp.concatenate([p["bias"] for p in ps], axis=1)}


def init_params(key, num_classes):
    pg = ParamGen(key)
    bcp = basic_conv_params
    P = {}
    P["Conv2d_1a_3x3"] = bcp(pg, 3, 32, 3, 3)
    P["Conv2d_2a_3x3"] = bcp(pg, 32, 32, 3, 3)
    P["Conv2d_2b_3x3"] = bcp(pg, 32, 64, 3, 3)
    P["Conv2d_3b_1x1"] = bcp(pg, 64, 80, 1, 1)
    P["Conv2d_4a_3x3"] = bcp(pg, 80, 192, 3, 3)

    def inceptionA(cin, pool_feat):
        head = _fuse_1x1(bcp(pg, cin, 64, 1, 1),     # b1x1
                         bcp(pg, cin, 48, 1, 1),     # b5x5_1
                         bcp(pg, cin, 64, 1, 1))     # b3dbl_1
        return {"head": head,
                "b5x5_2": bcp(pg, 48, 64, 5, 5),
                "b3dbl_2": bcp(pg, 64, 96, 3, 3),
                "b3dbl_3": bcp(pg, 96, 96, 3, 3),
                "bpool": bcp(pg, cin, pool_feat, 1, 1)}

    P["Mixed_5b"] = inceptionA(192, 32)
    P["Mixed_5c"] = inceptionA(256, 64)
    P["Mixed_5d"] = inceptionA(288, 64)

    P["Mixed_6a"] = {"b3x3": bcp(pg, 288, 384, 3, 3),
                     "b3dbl_1": bcp(pg, 288, 64, 1, 1),
                     "b3dbl_2": bcp(pg, 64, 96, 3, 3),
                     "b3dbl_3": bcp(pg, 96, 96, 3, 3)}

    def inceptionC(cin, c7):
        head = _fuse_1x1(bcp(pg, cin, 192, 1, 1),    # b1x1
                         bcp(pg, cin, c7, 1, 1),     # b7_1
                         bcp(pg, cin, c7, 1, 1))     # b7dbl_1
        return {"head": head,
                "b7_2": bcp(pg, c7, c7, 1, 7),
                "b7_3": bcp(pg, c7, 192, 7, 1),
                "b7dbl_2": bcp(pg, c7, c7, 7, 1),
                "b7dbl_3": bcp(pg, c7, c7, 1, 7),
                "b7dbl_4": bcp(pg, c7, c7, 7, 1),
                "b7dbl_5": bcp(pg, c7, 192, 1, 7),
                "bpool": bcp(pg, cin, 192, 1, 1)}

    P["Mixed_6b"] = inceptionC(768, 128)
    P["Mixed_6c"] = inceptionC(768, 160)
    P["Mixed_6d"] = inceptionC(768, 160)
    P["Mixed_6e"] = inceptionC(768, 192)

    P["Mixed_7a"] = {"head": _fuse_1x1(bcp(pg, 768, 192, 1, 1),   # b3_1
                                       bcp(pg, 768, 192, 1, 1)),  # b7x3_1
                     "b3_2": bcp(pg, 192, 320, 3, 3),
                     "b7x3_2": bcp(pg, 192, 192, 1, 7),
                     "b7x3_3": bcp(pg, 192, 192, 7, 1),
                     "b7x3_4": bcp(pg, 192, 192, 3, 3)}

    def inceptionE(cin):
        head = _fuse_1x1(bcp(pg, cin, 320, 1, 1),    # b1x1
                         bcp(pg, cin, 384, 1, 1),    # b3_1
                         bcp(pg, cin, 448, 1, 1))    # b3dbl_1
        return {"head": head,
                "b3_2a": bcp(pg, 384, 384, 1, 3),
                "b3_2b": bcp(pg, 384, 384, 3, 1),
                "b3dbl_2": bcp(pg, 448, 384, 3, 3),
                "b3dbl_3a": bcp(pg, 384, 384, 1, 3),
                "b3dbl_3b": bcp(pg, 384, 384, 3, 1),
                "bpool": bcp(pg, cin, 192, 1, 1)}

    P["Mixed_7b"] = inceptionE(1280)
    P["Mixed_7c"] = inceptionE(2048)

    fc_w = pg.normal((num_classes, 2048), 1.0 / math.sqrt(2048))
    fc_b = pg.normal((num_classes,), 1.0 / math.sqrt(2048))
    P["fc"] = {"wk": jnp.transpose(fc_w).astype(jnp.bfloat16),   # (2048, nc)
               "scale": jnp.ones((1, num_classes), jnp.float32),
               "bias": fc_b.reshape(1, num_classes)}
    return P


# ----------------------------------------------------------------------------
# InceptionV3 forward (eval: isTrain=False, use_aux=True, every_feat=False)
# ----------------------------------------------------------------------------
def inceptionA_fwd(p, x):
    head = conv_bn_act(x, p["head"])                       # [64 | 48 | 64]
    b1 = head[..., :64]
    b5 = conv_bn_act(head[..., 64:112], p["b5x5_2"], 5, 5, padding=(2, 2))
    bd = conv_bn_act(head[..., 112:176], p["b3dbl_2"], 3, 3, padding=(1, 1))
    bd = conv_bn_act(bd, p["b3dbl_3"], 3, 3, padding=(1, 1))
    bp = conv_bn_act(pool2d(x, "avg", 3, 1, 1), p["bpool"])
    return jnp.concatenate([b1, b5, bd, bp], axis=-1)


def inceptionB_fwd(p, x):
    b3 = conv_bn_act(x, p["b3x3"], 3, 3, stride=(2, 2))
    bd = conv_bn_act(x, p["b3dbl_1"])
    bd = conv_bn_act(bd, p["b3dbl_2"], 3, 3, padding=(1, 1))
    bd = conv_bn_act(bd, p["b3dbl_3"], 3, 3, stride=(2, 2))
    bp = pool2d(x, "max", 3, 2, 0)
    return jnp.concatenate([b3, bd, bp], axis=-1)


def inceptionC_fwd(p, x, c7):
    head = conv_bn_act(x, p["head"])                       # [192 | c7 | c7]
    b1 = head[..., :192]
    b7 = head[..., 192:192 + c7]
    bd = head[..., 192 + c7:192 + 2 * c7]
    b7 = conv_bn_act(b7, p["b7_2"], 1, 7, padding=(0, 3))
    b7 = conv_bn_act(b7, p["b7_3"], 7, 1, padding=(3, 0))
    bd = conv_bn_act(bd, p["b7dbl_2"], 7, 1, padding=(3, 0))
    bd = conv_bn_act(bd, p["b7dbl_3"], 1, 7, padding=(0, 3))
    bd = conv_bn_act(bd, p["b7dbl_4"], 7, 1, padding=(3, 0))
    bd = conv_bn_act(bd, p["b7dbl_5"], 1, 7, padding=(0, 3))
    bp = conv_bn_act(pool2d(x, "avg", 3, 1, 1), p["bpool"])
    return jnp.concatenate([b1, b7, bd, bp], axis=-1)


def inceptionD_fwd(p, x):
    head = conv_bn_act(x, p["head"])                       # [192 | 192]
    b3 = conv_bn_act(head[..., :192], p["b3_2"], 3, 3, stride=(2, 2))
    b7 = head[..., 192:384]
    b7 = conv_bn_act(b7, p["b7x3_2"], 1, 7, padding=(0, 3))
    b7 = conv_bn_act(b7, p["b7x3_3"], 7, 1, padding=(3, 0))
    b7 = conv_bn_act(b7, p["b7x3_4"], 3, 3, stride=(2, 2))
    bp = pool2d(x, "max", 3, 2, 0)
    return jnp.concatenate([b3, b7, bp], axis=-1)


def inceptionE_fwd(p, x):
    head = conv_bn_act(x, p["head"])                       # [320 | 384 | 448]
    b1 = head[..., :320]
    y = head[..., 320:704]
    z = head[..., 704:1152]
    b3 = jnp.concatenate(
        [conv_bn_act(y, p["b3_2a"], 1, 3, padding=(0, 1)),
         conv_bn_act(y, p["b3_2b"], 3, 1, padding=(1, 0))], axis=-1)
    z = conv_bn_act(z, p["b3dbl_2"], 3, 3, padding=(1, 1))
    bd = jnp.concatenate(
        [conv_bn_act(z, p["b3dbl_3a"], 1, 3, padding=(0, 1)),
         conv_bn_act(z, p["b3dbl_3b"], 3, 1, padding=(1, 0))], axis=-1)
    bp = conv_bn_act(pool2d(x, "avg", 3, 1, 1), p["bpool"])
    return jnp.concatenate([b1, b3, bd, bp], axis=-1)


def inception_forward(P, x_nchw, isTrain=False, use_aux=True, every_feat=False):
    c = conv_bn_act
    x = jnp.transpose(x_nchw, (0, 2, 3, 1)).astype(jnp.bfloat16)  # NCHW -> NHWC

    x = c(x, P["Conv2d_1a_3x3"], 3, 3, stride=(2, 2))
    x = c(x, P["Conv2d_2a_3x3"], 3, 3)
    x = c(x, P["Conv2d_2b_3x3"], 3, 3, padding=(1, 1))
    x = pool2d(x, "max", 3, 2, 0)
    x = c(x, P["Conv2d_3b_1x1"])
    x = c(x, P["Conv2d_4a_3x3"], 3, 3)
    x = pool2d(x, "max", 3, 2, 0)

    x = inceptionA_fwd(P["Mixed_5b"], x)
    x = inceptionA_fwd(P["Mixed_5c"], x)
    x = inceptionA_fwd(P["Mixed_5d"], x)
    x = inceptionB_fwd(P["Mixed_6a"], x)
    x = inceptionC_fwd(P["Mixed_6b"], x, 128)
    feat21 = x
    x = inceptionC_fwd(P["Mixed_6c"], x, 160)
    x = inceptionC_fwd(P["Mixed_6d"], x, 160)
    x = inceptionC_fwd(P["Mixed_6e"], x, 192)

    aux = None
    # TODO(synk): AuxLogits branch is only taken when isTrain and use_aux; this
    # script runs the module in eval mode (isTrain=False) so aux is None,
    # exactly matching the PyTorch forward.

    x = inceptionD_fwd(P["Mixed_7a"], x)
    x = inceptionE_fwd(P["Mixed_7b"], x)
    x = inceptionE_fwd(P["Mixed_7c"], x)

    feats = global_avg_pool(x)            # adaptive_avg_pool2d(1,1) + flatten
    # dropout(training=False) is the identity in eval mode.
    logits = linear(feats, P["fc"])
    if every_feat:
        return logits, feat21
    return logits, aux


# ----------------------------------------------------------------------------
if __name__ == "__main__":
    key = jax.random.PRNGKey(0)
    num_classes = 10
    params = init_params(jax.random.fold_in(key, 1), num_classes)

    # 75x75 is the smallest spatial size that survives every strided conv/pool
    # in the Inception v3 trunk; 3 input channels as the stem conv requires.
    x = jax.random.normal(jax.random.fold_in(key, 2), (2, 3, 75, 75), jnp.float32)

    # Sanity check: fused Pallas im2col conv+bn+relu vs a pure-JAX reference
    # (stem conv), using the same bf16-quantized inputs/weights on both sides.
    xb = jnp.transpose(x, (0, 2, 3, 1)).astype(jnp.bfloat16)
    p0 = params["Conv2d_1a_3x3"]
    w_hwio = p0["wk"][:27, :].astype(jnp.float32).reshape(3, 3, 3, 32)
    ref = jax.lax.conv_general_dilated(
        xb.astype(jnp.float32), w_hwio,
        window_strides=(2, 2), padding="VALID",
        dimension_numbers=("NHWC", "HWIO", "NHWC"),
        precision=jax.lax.Precision.HIGHEST)
    ref = jnp.maximum(ref * p0["scale"] + p0["bias"], 0.0)
    got = conv_bn_act(xb, p0, 3, 3, stride=(2, 2)).astype(jnp.float32)
    assert jnp.allclose(got, ref, atol=1e-1, rtol=1e-1), float(
        jnp.max(jnp.abs(got - ref)))

    fwd = jax.jit(inception_forward)
    logits, aux = fwd(params, x)
    logits = jax.block_until_ready(logits)

    assert logits.shape == (2, num_classes)
    assert aux is None
    assert bool(jnp.all(jnp.isfinite(logits)))
    print("KERNEL_OK")
</pallas_src>

<mosaic_0001>
module attributes {stable_mosaic.version = 11 : i64} {
  func.func @kernel(%arg0: i32, %arg1: i32, %arg2: i32, %arg3: memref<464x27xbf16, #tpu.memory_space<vmem>>, %arg4: memref<27x32xbf16, #tpu.memory_space<vmem>>, %arg5: memref<1x32xf32, #tpu.memory_space<vmem>>, %arg6: memref<1x32xf32, #tpu.memory_space<vmem>>, %arg7: memref<464x32xbf16, #tpu.memory_space<vmem>>, %arg8: memref<464x32xf32, #tpu.memory_space<vmem>>) attributes {dimension_semantics = [#tpu.dimension_semantics<parallel>, #tpu.dimension_semantics<parallel>, #tpu.dimension_semantics<arbitrary>], iteration_bounds = array<i64: 6, 1, 1>, scalar_prefetch = 0 : i64, scratch_operands = 1 : i64, tpu.core_type = #tpu.core_type<tc>, window_params = [{transform_indices = @transform_0, window_bounds = array<i64: 464, 27>}, {transform_indices = @transform_1, window_bounds = array<i64: 27, 32>}, {transform_indices = @transform_2, window_bounds = array<i64: 1, 32>}, {transform_indices = @transform_3, window_bounds = array<i64: 1, 32>}, {transform_indices = @transform_4, window_bounds = array<i64: 464, 32>}]} {
    %c0_i32 = arith.constant 0 : i32
    %0 = arith.cmpi eq, %arg2, %c0_i32 : i32
    %1 = arith.extui %0 : i1 to i32
    %c0_i32_0 = arith.constant 0 : i32
    %2 = arith.cmpi ne, %1, %c0_i32_0 : i32
    scf.if %2 {
      %cst_10 = arith.constant 0.000000e+00 : f32
      %12 = vector.broadcast %cst_10 : f32 to vector<464x32xf32>
      %c0_11 = arith.constant 0 : index
      %c0_12 = arith.constant 0 : index
      %13 = vector.load %arg8[%c0_11, %c0_12] : memref<464x32xf32, #tpu.memory_space<vmem>>, vector<464x32xf32>
      tpu.vector_store %arg8[%c0_11, %c0_12], %12 {strides = array<i32>} : memref<464x32xf32, #tpu.memory_space<vmem>>, vector<464x32xf32>,
    } else {
    }
    %c0 = arith.constant 0 : index
    %c0_1 = arith.constant 0 : index
    %3 = vector.load %arg8[%c0, %c0_1] : memref<464x32xf32, #tpu.memory_space<vmem>>, vector<464x32xf32>
    %c0_2 = arith.constant 0 : index
    %c0_3 = arith.constant 0 : index
    %4 = vector.load %arg3[%c0_2, %c0_3] : memref<464x27xbf16, #tpu.memory_space<vmem>>, vector<464x27xbf16>
    %c0_4 = arith.constant 0 : index
    %c0_5 = arith.constant 0 : index
    %5 = vector.load %arg4[%c0_4, %c0_5] : memref<27x32xbf16, #tpu.memory_space<vmem>>, vector<27x32xbf16>
    %cst = arith.constant dense<0.000000e+00> : vector<464x32xf32>
    %6 = tpu.matmul %4, %5, %cst {dimension_numbers = #tpu.dot_dimension_numbers<[1], [0], [0], [1], [0, 0, 1, 1], [], []>} : vector<464x27xbf16>, vector<27x32xbf16>, vector<464x32xf32> -> vector<464x32xf32>
    %7 = arith.addf %3, %6 : vector<464x32xf32>
    %c0_6 = arith.constant 0 : index
    %c0_7 = arith.constant 0 : index
    %8 = vector.load %arg8[%c0_6, %c0_7] : memref<464x32xf32, #tpu.memory_space<vmem>>, vector<464x32xf32>
    tpu.vector_store %arg8[%c0_6, %c0_7], %7 {strides = array<i32>} : memref<464x32xf32, #tpu.memory_space<vmem>>, vector<464x32xf32>,
    %c0_i32_8 = arith.constant 0 : i32
    %9 = arith.cmpi eq, %arg2, %c0_i32_8 : i32
    %10 = arith.extui %9 : i1 to i32
    %c0_i32_9 = arith.constant 0 : i32
    %11 = arith.cmpi ne, %10, %c0_i32_9 : i32
    scf.if %11 {
      %c0_10 = arith.constant 0 : index
      %c0_11 = arith.constant 0 : index
      %12 = vector.load %arg8[%c0_10, %c0_11] : memref<464x32xf32, #tpu.memory_space<vmem>>, vector<464x32xf32>
      %c0_12 = arith.constant 0 : index
      %c0_13 = arith.constant 0 : index
      %13 = vector.load %arg5[%c0_12, %c0_13] : memref<1x32xf32, #tpu.memory_space<vmem>>, vector<1x32xf32>
      %14 = vector.broadcast %13 : vector<1x32xf32> to vector<464x32xf32>
      %15 = arith.mulf %12, %14 : vector<464x32xf32>
      %c0_14 = arith.constant 0 : index
      %c0_15 = arith.constant 0 : index
      %16 = vector.load %arg6[%c0_14, %c0_15] : memref<1x32xf32, #tpu.memory_space<vmem>>, vector<1x32xf32>
      %17 = vector.broadcast %16 : vector<1x32xf32> to vector<464x32xf32>
      %18 = arith.addf %15, %17 : vector<464x32xf32>
      %cst_16 = arith.constant 0.000000e+00 : f32
      %19 = vector.broadcast %cst_16 : f32 to vector<464x32xf32>
      %20 = arith.maximumf %18, %19 : vector<464x32xf32>
      %21 = arith.truncf %20 : vector<464x32xf32> to vector<464x32xbf16>
      %c0_17 = arith.constant 0 : index
      %c0_18 = arith.constant 0 : index
      %22 = vector.load %arg7[%c0_17, %c0_18] : memref<464x32xbf16, #tpu.memory_space<vmem>>, vector<464x32xbf16>
      tpu.vector_store %arg7[%c0_17, %c0_18], %21 {strides = array<i32>} : memref<464x32xbf16, #tpu.memory_space<vmem>>, vector<464x32xbf16>,
    } else {
    }
    return
  }
  func.func @transform_0(%arg0: i32, %arg1: i32, %arg2: i32) -> (i32, i32) {
    %c0_i32 = arith.constant 0 : i32
    return %arg0, %arg2 : i32, i32
  }
  func.func @transform_1(%arg0: i32, %arg1: i32, %arg2: i32) -> (i32, i32) {
    %c0_i32 = arith.constant 0 : i32
    return %arg2, %arg1 : i32, i32
  }
  func.func @transform_2(%arg0: i32, %arg1: i32, %arg2: i32) -> (i32, i32) {
    %c0_i32 = arith.constant 0 : i32
    %c0_i32_0 = arith.constant 0 : i32
    return %c0_i32, %arg1 : i32, i32
  }
  func.func @transform_3(%arg0: i32, %arg1: i32, %arg2: i32) -> (i32, i32) {
    %c0_i32 = arith.constant 0 : i32
    %c0_i32_0 = arith.constant 0 : i32
    return %c0_i32, %arg1 : i32, i32
  }
  func.func @transform_4(%arg0: i32, %arg1: i32, %arg2: i32) -> (i32, i32) {
    %c0_i32 = arith.constant 0 : i32
    return %arg0, %arg1 : i32, i32
  }
}

</mosaic_0001>

<bundles_post_ra>
// kernel: tpu_custom_call.1
= control target key start
LH: loop header
LB: loop body
LE: loop exit
PB: predicated region body
PF: predicated region fallthrough
CT: control target
= control target key end

     0   :  { %s2805_s15 = smov 0   ;;  %s2807_s16 = smov 0   ;;  %s3608_s0 = inlined_call_operand.vmem [shape: bf16[2738,27], index: 0, kind: input, shape index: {}]   ;;  %s3609_s1 = inlined_call_operand.vmem [shape: bf16[27,32], index: 1, kind: input, shape index: {}]   ;;  %s3610_s2 = inlined_call_operand.vmem [shape: f32[1,32], index: 2, kind: input, shape index: {}]   ;;  %s3611_s3 = inlined_call_operand.vmem [shape: f32[1,32], index: 3, kind: input, shape index: {}]   ;;  %s3612_s4 = inlined_call_operand.vmem [shape: bf16[2738,32], index: 4, kind: output, shape index: {}]  }
   0x1   :  { %s2809_s17 = smov 0   ;;  %s2811_s18 = smov 0  }
   0x2   :  { %s2813_s19 = smov 0  }
   0x3 LB: > { %s2172_s20 = sadd.s32 4294967295, %s2743_s19   ;;  %s33_s21 = sadd.s32 1, %s2739_s18  ;;  %s2743_s19 = sphi %s2813_s19, %s14_s19   ;;  %s2739_s18 = sphi %s2811_s18, %s3620_s18   ;;  %s2735_s17 = sphi %s2809_s17, %s3619_s17   ;;  %s2731_s16 = sphi %s2807_s16, %s3618_s16   ;;  %s2727_s15 = sphi %s2805_s15, %s3617_s15  }
   0x4   : > { %p35_p0 = scmp.ge.s32.totalorder %s33_s21, 6  ;;  %s150_s22 = sadd.s32 1, %s2731_s16 }
   0x5   : > { %p160_p1 = scmp.ne.s32.totalorder %s2731_s16, %s2727_s15  ;;  %p161_p2 = scmp.eq.s32.totalorder %s2172_s20, 5 }
   0x6   : > { %s3622_s21 = smov (%p35_p0, %s33_s21), 0  ;;  %p2179_p4 = scmp.ge.s32.totalorder %s2743_s19, 1 }
   0x7   : > { %p2837_p3 = por %p161_p2, %p160_p1  ;;  %s145_s24 = ssub.s32 %s2739_s18, %s3622_s21 }
   0x8   : > { %p229_p5 = scmp.lt.s32.totalorder %s2743_s19, 7  ;;  %p148_p6 = scmp.eq.s32.totalorder %s145_s24, 0 }
   0xa   : > { %p230_p7 = pnand %p2179_p4, %p229_p5 }
   0xb   : > { %s2846_s25 = scalar_select %p148_p6, %s2731_s16, %s150_s22  }
   0xc   : > { %233 = sbr.rel (%p230_p7) target bundleno = 470 (0x1d6), region = 36  ;;  %v2636_v0 = vld [vmem:[%s3609_s1] sm:$0xff] (!%p230_p7)   ;;  %v2777_v1 = vmov (!%p230_p7), 0.0   ;;  %v2856_v2 = vld [vmem:[%s3609_s1 + $0x8] sm:$0x3f] (!%p230_p7)   ;;  %vm740_vm0 = vcmask (!%p230_p7), 1044480  }
   0xd   : > { %2403 = vmatprep.subr.bf16.mxu0 (!%p230_p7), %v2777_v1  ;;  %2523 = vmatprep.subr.bf16.mxu1 (!%p230_p7), %v2777_v1  ;;  %vm741_vm1 = vcmask (!%p230_p7), 1045504   ;;  %s2859_s30 = smul.u32 (!%p230_p7), 58, %s2735_s17  ;;  %v2778_v3 = vmov (!%p230_p7), 65535   ;;  %vm2779_vm2 = vmmov (!%p230_p7), 0   ;;  %vm317_vm3 = vcmask (!%p230_p7), 261120   ;;  %s272_s12 = sand.u32 (!%p230_p7), 1, %s2727_s15  }
   0xe   : > { %2404 = vmatpush3.bf16.msra.mxu0 (!%p230_p7), %v2636_v0  ;;  %2525 = vmatpush3.bf16.msra.mxu1 (!%p230_p7), %v2636_v0  ;;  %v742_v4 = vsel (!%p230_p7), %vm740_vm0, 4294967295, %v2778_v3  ;;  %318 = vst.msk [vmem:[#allocation2] sm:$0xff] (!%p230_p7), %vm317_vm3, %v2777_v1  ;;  %319 = vst.msk [vmem:[#allocation2 + $0x8] sm:$0xff] (!%p230_p7), %vm317_vm3, %v2777_v1  ;;  %vm652_vm4 = vcmask (!%p230_p7), 220160   ;;  %v3112_v54 = vld [vmem:[%s3610_s2] ss:$0 sm:$0xff] (!%p230_p7) }
   0xf   : > { %2405 = vmatprep.subr.bf16.mxu0 (!%p230_p7), %v2777_v1  ;;  %2407 = vmatprep.mubr.msk.bf16.mxu0 (!%p230_p7), %vm2779_vm2, %v2777_v1  ;;  %v743_v5 = vsel (!%p230_p7), %vm741_vm1, %v742_v4, 0  ;;  %p280_p8 = scmp.lt.s32.totalorder (!%p230_p7), %s2859_s30, 342  ;;  %320 = vst.msk [vmem:[#allocation2 + $0x10] sm:$0xff] (!%p230_p7), %vm317_vm3, %v2777_v1  ;;  %321 = vst.msk [vmem:[#allocation2 + $0x18] sm:$0xff] (!%p230_p7), %vm317_vm3, %v2777_v1  ;;  %v3118_v62 = vld [vmem:[%s3611_s3] ss:$0 sm:$0xff] (!%p230_p7) }
  0x10   : > { %2524 = vmatprep.subr.bf16.mxu1 (!%p230_p7), %v2777_v1  ;;  %2467 = vmatprep.mubr.msk.bf16.mxu1 (!%p230_p7), %vm2779_vm2, %v2777_v1  ;;  %322 = vst.msk [vmem:[#allocation2 + $0x20] sm:$0xff] (!%p230_p7), %vm317_vm3, %v2777_v1  ;;  %323 = vst.msk [vmem:[#allocation2 + $0x28] sm:$0xff] (!%p230_p7), %vm317_vm3, %v2777_v1  ;;  %v745_v6 = vand.u32 (!%p230_p7), %v2856_v2, %v743_v5  ;;  %s3122_s15 = smul.u32 (!%p230_p7), 232, %s272_s12  ;;  %vm1610_vm5 = vcmask (!%p230_p7), 257024  }
  0x11   : > { %324 = vst.msk [vmem:[#allocation2 + $0x30] sm:$0xff] (!%p230_p7), %vm317_vm3, %v2777_v1  ;;  %325 = vst.msk [vmem:[#allocation2 + $0x38] sm:$0xff] (!%p230_p7), %vm317_vm3, %v2777_v1 }
  0x12   : > { %326 = vst.msk [vmem:[#allocation2 + $0x40] sm:$0xff] (!%p230_p7), %vm317_vm3, %v2777_v1  ;;  %327 = vst.msk [vmem:[#allocation2 + $0x48] sm:$0xff] (!%p230_p7), %vm317_vm3, %v2777_v1  ;;  %2406 = vmatpush3.bf16.msra.mxu0 (!%p230_p7), %v745_v6  ;;  %2526 = vmatpush3.bf16.msra.mxu1 (!%p230_p7), %v745_v6  ;;  %s3135_s20 = scalar_lea.vmem (!%p230_p7), [#allocation3], %s3122_s15  }
  0x13   : > { %328 = vst.msk [vmem:[#allocation2 + $0x50] sm:$0xff] %vm317_vm3, %v2777_v1  ;;  %329 = vst.msk [vmem:[#allocation2 + $0x58] sm:$0xff] %vm317_vm3, %v2777_v1  ;;  %s281_s5 = scalar_select %p280_p8, %s2859_s30, 342 }
  0x14   : > { %330 = vst.msk [vmem:[#allocation2 + $0x60] sm:$0xff] %vm317_vm3, %v2777_v1  ;;  %331 = vst.msk [vmem:[#allocation2 + $0x68] sm:$0xff] %vm317_vm3, %v2777_v1  ;;  %s1677_s28 = ssub.s32 (%p2837_p3), 343, %s2859_s30  ;;  %s2371_s29 = smul.u32 (%p2837_p3), 232, %s2735_s17 }
  0x15   : > { %332 = vst.msk [vmem:[#allocation2 + $0x70] sm:$0xff] %vm317_vm3, %v2777_v1  ;;  %333 = vst.msk [vmem:[#allocation2 + $0x78] sm:$0xff] %vm317_vm3, %v2777_v1  ;;  %s2180_s6 = sshll.u32 %s281_s5, 2  ;;  %v376_v36 = vld [vmem:[#allocation2] sm:$0xff]  ;;  %v377_v39 = vld [vmem:[#allocation2 + $0x8] sm:$0xff]  ;;  %p1678_p9 = scmp.lt.s32.totalorder (%p2837_p3), %s1677_s28, 58 }
  0x16   : > { %334 = vst.msk [vmem:[#allocation2 + $0x80] sm:$0xff] %vm317_vm3, %v2777_v1  ;;  %335 = vst.msk [vmem:[#allocation2 + $0x88] sm:$0xff] %vm317_vm3, %v2777_v1  ;;  %s2991_s9 = scalar_lea.vmem %s3608_s0, %s2180_s6  ;;  %v378_v52 = vld [vmem:[#allocation2 + $0x10] sm:$0xff]  ;;  %v379_v56 = vld [vmem:[#allocation2 + $0x18] sm:$0xff]  ;;  %s3428_s7 = scalar_lea.vmem (%p2837_p3), %s3612_s4, %s2371_s29  }
  0x17   : > { %336 = vst.msk [vmem:[#allocation2 + $0x90] sm:$0xff] %vm317_vm3, %v2777_v1  ;;  %337 = vst.msk [vmem:[#allocation2 + $0x98] sm:$0xff] %vm317_vm3, %v2777_v1  ;;  %v2638_v7 = vld [vmem:[%s2991_s9] sm:$0xff]   ;;  %v2639_v8 = vld [vmem:[%s2991_s9 + $0x78] sm:$0xff]  }
  0x18   : > { %338 = vst.msk [vmem:[#allocation2 + $0xa0] sm:$0xff] %vm317_vm3, %v2777_v1  ;;  %339 = vst.msk [vmem:[#allocation2 + $0xa8] sm:$0xff] %vm317_vm3, %v2777_v1  ;;  %2408 = vmatmul.mubr.msk.bf16.vlgmr.msra.gmra.mrb[0].mxu0 %vm652_vm4, %v2638_v7  ;;  %2468 = vmatmul.mubr.msk.bf16.vlgmr.msra.gmra.mrb[0].mxu1 %vm652_vm4, %v2639_v8  ;;  %v2640_v9 = vld [vmem:[%s2991_s9 + $0x8] sm:$0xff]   ;;  %v2641_v10 = vld [vmem:[%s2991_s9 + $0x80] sm:$0xff]  }
  0x19   : > { %340 = vst.msk [vmem:[#allocation2 + $0xb0] sm:$0xff] %vm317_vm3, %v2777_v1  ;;  %341 = vst.msk [vmem:[#allocation2 + $0xb8] sm:$0xff] %vm317_vm3, %v2777_v1  ;;  %2411 = vmatprep.mubr.msk.bf16.mxu0 %vm2779_vm2, %v2777_v1  ;;  %2471 = vmatprep.mubr.msk.bf16.mxu1 %vm2779_vm2, %v2777_v1  ;;  %v2642_v11 = vld [vmem:[%s2991_s9 + $0x10] sm:$0xff]   ;;  %v2643_v12 = vld [vmem:[%s2991_s9 + $0x88] sm:$0xff]  }
  0x1a   : > { %342 = vst.msk [vmem:[#allocation2 + $0xc0] sm:$0xff] %vm317_vm3, %v2777_v1  ;;  %343 = vst.msk [vmem:[#allocation2 + $0xc8] sm:$0xff] %vm317_vm3, %v2777_v1  ;;  %v2644_v13 = vld [vmem:[%s2991_s9 + $0x18] sm:$0xff]   ;;  %v2645_v14 = vld [vmem:[%s2991_s9 + $0x90] sm:$0xff]  }
  0x1b   : > { %344 = vst.msk [vmem:[#allocation2 + $0xd0] sm:$0xff] %vm317_vm3, %v2777_v1  ;;  %345 = vst.msk [vmem:[#allocation2 + $0xd8] sm:$0xff] %vm317_vm3, %v2777_v1  ;;  %v2646_v15 = vld [vmem:[%s2991_s9 + $0x20] sm:$0xff]   ;;  %v2647_v16 = vld [vmem:[%s2991_s9 + $0x98] sm:$0xff]  }
  0x1c   : > { %346 = vst.msk [vmem:[#allocation2 + $0xe0] sm:$0xff] %vm317_vm3, %v2777_v1  ;;  %347 = vst.msk [vmem:[#allocation2 + $0xe8] sm:$0xff] %vm317_vm3, %v2777_v1  ;;  %v2648_v17 = vld [vmem:[%s2991_s9 + $0x28] sm:$0xff]   ;;  %v2649_v18 = vld [vmem:[%s2991_s9 + $0xa0] sm:$0xff]  }
  0x1d   : > { %348 = vst.msk [vmem:[#allocation2 + $0xf0] sm:$0xff] %vm317_vm3, %v2777_v1  ;;  %349 = vst.msk [vmem:[#allocation2 + $0xf8] sm:$0xff] %vm317_vm3, %v2777_v1  ;;  %v2650_v19 = vld [vmem:[%s2991_s9 + $0x30] sm:$0xff]   ;;  %v2651_v20 = vld [vmem:[%s2991_s9 + $0xa8] sm:$0xff]  }
  0x1e   : > { %350 = vst.msk [vmem:[#allocation2 + $0x100] sm:$0xff] %vm317_vm3, %v2777_v1  ;;  %351 = vst.msk [vmem:[#allocation2 + $0x108] sm:$0xff] %vm317_vm3, %v2777_v1  ;;  %v2652_v21 = vld [vmem:[%s2991_s9 + $0x38] sm:$0xff]   ;;  %v2653_v22 = vld [vmem:[%s2991_s9 + $0xb0] sm:$0xff]  }
  0x1f   : > { %352 = vst.msk [vmem:[#allocation2 + $0x110] sm:$0xff] %vm317_vm3, %v2777_v1  ;;  %353 = vst.msk [vmem:[#allocation2 + $0x118] sm:$0xff] %vm317_vm3, %v2777_v1  ;;  %v2654_v23 = vld [vmem:[%s2991_s9 + $0x40] sm:$0xff]   ;;  %v2655_v24 = vld [vmem:[%s2991_s9 + $0xb8] sm:$0xff]  }
  0x20   : > { %354 = vst.msk [vmem:[#allocation2 + $0x120] sm:$0xff] %vm317_vm3, %v2777_v1  ;;  %355 = vst.msk [vmem:[#allocation2 + $0x128] sm:$0xff] %vm317_vm3, %v2777_v1  ;;  %2412 = vmatmul.mubr.msk.bf16.gmra.mrb[4].mxu0 %vm652_vm4, %v2640_v9  ;;  %2472 = vmatmul.mubr.msk.bf16.gmra.mrb[4].mxu1 %vm652_vm4, %v2641_v10  ;;  %v2656_v25 = vld [vmem:[%s2991_s9 + $0x48] sm:$0xff]   ;;  %v2657_v26 = vld [vmem:[%s2991_s9 + $0xc0] sm:$0xff]  }
  0x21   : > { %356 = vst.msk [vmem:[#allocation2 + $0x130] sm:$0xff] %vm317_vm3, %v2777_v1  ;;  %357 = vst.msk [vmem:[#allocation2 + $0x138] sm:$0xff] %vm317_vm3, %v2777_v1  ;;  %2415 = vmatprep.mubr.msk.bf16.mxu0 %vm2779_vm2, %v2777_v1  ;;  %2475 = vmatprep.mubr.msk.bf16.mxu1 %vm2779_vm2, %v2777_v1  ;;  %v2658_v27 = vld [vmem:[%s2991_s9 + $0x50] sm:$0xff]   ;;  %v2659_v28 = vld [vmem:[%s2991_s9 + $0xc8] sm:$0xff]  }
  0x22   : > { %358 = vst.msk [vmem:[#allocation2 + $0x140] sm:$0xff] %vm317_vm3, %v2777_v1  ;;  %359 = vst.msk [vmem:[#allocation2 + $0x148] sm:$0xff] %vm317_vm3, %v2777_v1  ;;  %v2660_v29 = vld [vmem:[%s2991_s9 + $0x58] sm:$0xff]   ;;  %v2661_v30 = vld [vmem:[%s2991_s9 + $0xd0] sm:$0xff]  }
  0x23   : > { %360 = vst.msk [vmem:[#allocation2 + $0x150] sm:$0xff] %vm317_vm3, %v2777_v1  ;;  %361 = vst.msk [vmem:[#allocation2 + $0x158] sm:$0xff] %vm317_vm3, %v2777_v1  ;;  %v2662_v31 = vld [vmem:[%s2991_s9 + $0x60] sm:$0xff]   ;;  %v2663_v32 = vld [vmem:[%s2991_s9 + $0xd8] sm:$0xff]  }
  0x24   : > { %362 = vst.msk [vmem:[#allocation2 + $0x160] sm:$0xff] %vm317_vm3, %v2777_v1  ;;  %363 = vst.msk [vmem:[#allocation2 + $0x168] sm:$0xff] %vm317_vm3, %v2777_v1  ;;  %v2664_v33 = vld [vmem:[%s2991_s9 + $0x68] sm:$0xff]   ;;  %v2665_v34 = vld [vmem:[%s2991_s9 + $0xe0] sm:$0xff]  }
  0x25   : > { %364 = vst.msk [vmem:[#allocation2 + $0x170] sm:$0xff] %vm317_vm3, %v2777_v1  ;;  %365 = vst.msk [vmem:[#allocation2 + $0x178] sm:$0xff] %vm317_vm3, %v2777_v1  ;;  %v2666_v35 = vld [vmem:[%s2991_s9 + $0x70] sm:$0xff]   ;;  %v407_v43 = vld [vmem:[#allocation2 + $0xf8] sm:$0xff] }
  0x26   : > { %366 = vst.msk [vmem:[#allocation2 + $0x180] sm:$0xff] %vm317_vm3, %v2777_v1  ;;  %367 = vst.msk [vmem:[#allocation2 + $0x188] sm:$0xff] %vm317_vm3, %v2777_v1  ;;  %v406_v37 = vld [vmem:[#allocation2 + $0xf0] sm:$0xff]  ;;  %v408_v53 = vld [vmem:[#allocation2 + $0x100] sm:$0xff] }
  0x27   : > { %368 = vst.msk [vmem:[#allocation2 + $0x190] sm:$0xff] %vm317_vm3, %v2777_v1  ;;  %369 = vst.msk [vmem:[#allocation2 + $0x198] sm:$0xff] %vm317_vm3, %v2777_v1  ;;  %v409_v60 = vld [vmem:[#allocation2 + $0x108] sm:$0xff] }
  0x28   : > { %370 = vst.msk [vmem:[#allocation2 + $0x1a0] sm:$0xff] %vm317_vm3, %v2777_v1  ;;  %371 = vst.msk [vmem:[#allocation2 + $0x1a8] sm:$0xff] %vm317_vm3, %v2777_v1  ;;  %2416 = vmatmul.mubr.msk.bf16.gmra.mrb[8].mxu0 %vm652_vm4, %v2642_v11  ;;  %2476 = vmatmul.mubr.msk.bf16.gmra.mrb[8].mxu1 %vm652_vm4, %v2643_v12 }
  0x29   : > { %372 = vst.msk [vmem:[#allocation2 + $0x1b0] sm:$0xff] %vm317_vm3, %v2777_v1  ;;  %373 = vst.msk [vmem:[#allocation2 + $0x1b8] sm:$0xff] %vm317_vm3, %v2777_v1  ;;  %2419 = vmatprep.mubr.msk.bf16.mxu0 %vm2779_vm2, %v2777_v1  ;;  %2479 = vmatprep.mubr.msk.bf16.mxu1 %vm2779_vm2, %v2777_v1 }
  0x2a   : > { %374 = vst.msk [vmem:[#allocation2 + $0x1c0] sm:$0xff] %vm317_vm3, %v2777_v1  ;;  %375 = vst.msk [vmem:[#allocation2 + $0x1c8] sm:$0xff] %vm317_vm3, %v2777_v1 }
  0x30   : > { %2420 = vmatmul.mubr.msk.bf16.gmra.mrb[12].mxu0 %vm652_vm4, %v2644_v13  ;;  %2480 = vmatmul.mubr.msk.bf16.gmra.mrb[12].mxu1 %vm652_vm4, %v2645_v14 }
  0x31   : > { %2423 = vmatprep.mubr.msk.bf16.mxu0 %vm2779_vm2, %v2777_v1  ;;  %2483 = vmatprep.mubr.msk.bf16.mxu1 %vm2779_vm2, %v2777_v1 }
  0x38   : > { %2424 = vmatmul.mubr.msk.bf16.gmra.mrb[16].mxu0 %vm652_vm4, %v2646_v15  ;;  %2484 = vmatmul.mubr.msk.bf16.gmra.mrb[16].mxu1 %vm652_vm4, %v2647_v16  ;;  %v380_v16 = vld [vmem:[#allocation2 + $0x20] sm:$0xff] }
  0x39   : > { %2427 = vmatprep.mubr.msk.bf16.mxu0 %vm2779_vm2, %v2777_v1  ;;  %2487 = vmatprep.mubr.msk.bf16.mxu1 %vm2779_vm2, %v2777_v1 }
  0x40   : > { %2428 = vmatmul.mubr.msk.bf16.gmra.mrb[20].mxu0 %vm652_vm4, %v2648_v17  ;;  %2488 = vmatmul.mubr.msk.bf16.gmra.mrb[20].mxu1 %vm652_vm4, %v2649_v18 }
  0x41   : > { %2431 = vmatprep.mubr.msk.bf16.mxu0 %vm2779_vm2, %v2777_v1  ;;  %2491 = vmatprep.mubr.msk.bf16.mxu1 %vm2779_vm2, %v2777_v1 }
  0x48   : > { %2432 = vmatmul.mubr.msk.bf16.gmra.mrb[24].mxu0 %vm652_vm4, %v2650_v19  ;;  %2492 = vmatmul.mubr.msk.bf16.gmra.mrb[24].mxu1 %vm652_vm4, %v2651_v20  ;;  %v410_v19 = vld [vmem:[#allocation2 + $0x110] sm:$0xff] }
  0x49   : > { %2435 = vmatprep.mubr.msk.bf16.mxu0 %vm2779_vm2, %v2777_v1  ;;  %2495 = vmatprep.mubr.msk.bf16.mxu1 %vm2779_vm2, %v2777_v1 }
  0x50   : > { %2436 = vmatmul.mubr.msk.bf16.gmra.mrb[28].mxu0 %vm652_vm4, %v2652_v21  ;;  %2496 = vmatmul.mubr.msk.bf16.gmra.mrb[28].mxu1 %vm652_vm4, %v2653_v22 }
  0x51   : > { %2439 = vmatprep.mubr.msk.bf16.mxu0 %vm2779_vm2, %v2777_v1  ;;  %2499 = vmatprep.mubr.msk.bf16.mxu1 %vm2779_vm2, %v2777_v1 }
  0x58   : > { %2440 = vmatmul.mubr.msk.bf16.gmra.mrb[32].mxu0 %vm652_vm4, %v2654_v23  ;;  %2500 = vmatmul.mubr.msk.bf16.gmra.mrb[32].mxu1 %vm652_vm4, %v2655_v24  ;;  %v381_v23 = vld [vmem:[#allocation2 + $0x28] sm:$0xff] }
  0x59   : > { %2443 = vmatprep.mubr.msk.bf16.mxu0 %vm2779_vm2, %v2777_v1  ;;  %2503 = vmatprep.mubr.msk.bf16.mxu1 %vm2779_vm2, %v2777_v1 }
  0x60   : > { %2444 = vmatmul.mubr.msk.bf16.gmra.mrb[36].mxu0 %vm652_vm4, %v2656_v25  ;;  %2504 = vmatmul.mubr.msk.bf16.gmra.mrb[36].mxu1 %vm652_vm4, %v2657_v26 }
  0x61   : > { %2447 = vmatprep.mubr.msk.bf16.mxu0 %vm2779_vm2, %v2777_v1  ;;  %2507 = vmatprep.mubr.msk.bf16.mxu1 %vm2779_vm2, %v2777_v1 }
  0x68   : > { %2448 = vmatmul.mubr.msk.bf16.gmra.mrb[40].mxu0 %vm652_vm4, %v2658_v27  ;;  %2508 = vmatmul.mubr.msk.bf16.gmra.mrb[40].mxu1 %vm652_vm4, %v2659_v28 }
  0x69   : > { %2451 = vmatprep.mubr.msk.bf16.mxu0 %vm2779_vm2, %v2777_v1  ;;  %2511 = vmatprep.mubr.msk.bf16.mxu1 %vm2779_vm2, %v2777_v1 }
  0x70   : > { %2452 = vmatmul.mubr.msk.bf16.gmra.mrb[44].mxu0 %vm652_vm4, %v2660_v29  ;;  %2512 = vmatmul.mubr.msk.bf16.gmra.mrb[44].mxu1 %vm652_vm4, %v2661_v30  ;;  %v411_v29 = vld [vmem:[#allocation2 + $0x118] sm:$0xff] }
  0x71   : > { %2455 = vmatprep.mubr.msk.bf16.mxu0 %vm2779_vm2, %v2777_v1  ;;  %2515 = vmatprep.mubr.msk.bf16.mxu1 %vm2779_vm2, %v2777_v1 }
  0x78   : > { %2456 = vmatmul.mubr.msk.bf16.gmra.mrb[48].mxu0 %vm652_vm4, %v2662_v31  ;;  %2516 = vmatmul.mubr.msk.bf16.gmra.mrb[48].mxu1 %vm652_vm4, %v2663_v32 }
  0x79   : > { %2459 = vmatprep.mubr.msk.bf16.mxu0 %vm2779_vm2, %v2777_v1  ;;  %2519 = vmatprep.mubr.msk.bf16.mxu1 %vm2779_vm2, %v2777_v1 }
  0x80   : > { %2460 = vmatmul.mubr.msk.bf16.gmra.mrb[52].mxu0 %vm652_vm4, %v2664_v33  ;;  %2520 = vmatmul.mubr.msk.bf16.gmra.mrb[52].mxu1 %vm652_vm4, %v2665_v34 }
  0x81   : > { %2463 = vmatprep.mubr.msk.bf16.mxu0 %vm2779_vm2, %v2777_v1 }
  0x88   : > { %2464 = vmatmul.mubr.msk.bf16.gmra.mrb[56].mxu0 %vm652_vm4, %v2666_v35 }
  0xeb   : > { %v781_v38 = vpop.f32.mrb[0].mxu0  ;;  %v901_v42 = vpop.f32.mrb[0].mxu1 }
  0xec   : > { %v1012_v40 = vadd.f32 %v781_v38, %v376_v36  ;;  %v2409_v41 = vpop.f32.mrb[1].mxu0  ;;  %v1042_v45 = vadd.f32 %v901_v42, %v406_v37  ;;  %v2469_v46 = vpop.f32.mrb[1].mxu1 }
  0xed   : > { %v784_v44 = vpop.f32.mrb[2].mxu0  ;;  %v904_v49 = vpop.f32.mrb[2].mxu1 }
  0xee   : > { %1071 = vst.msk [vmem:[#allocation2] sm:$0xff] %vm317_vm3, %v1012_v40  ;;  %v1013_v47 = vadd.f32 %v784_v44, %v377_v39  ;;  %v2410_v48 = vpop.f32.mrb[3].mxu0  ;;  %1101 = vst.msk [vmem:[#allocation2 + $0xf0] sm:$0xff] %vm317_vm3, %v1042_v45  ;;  %v1043_v50 = vadd.f32 %v904_v49, %v407_v43  ;;  %v2470_v51 = vpop.f32.mrb[3].mxu1 }
  0xf0   : > { %1072 = vst.msk [vmem:[#allocation2 + $0x8] sm:$0xff] %vm317_vm3, %v1013_v47  ;;  %1102 = vst.msk [vmem:[#allocation2 + $0xf8] sm:$0xff] %vm317_vm3, %v1043_v50 }
  0xf3   : > { %v789_v55 = vpop.f32.mrb[4].mxu0  ;;  %v909_v59 = vpop.f32.mrb[4].mxu1 }
  0xf4   : > { %v1014_v57 = vadd.f32 %v789_v55, %v378_v52  ;;  %v2413_v58 = vpop.f32.mrb[5].mxu0  ;;  %v1044_v0 = vadd.f32 %v909_v59, %v408_v53  ;;  %v2473_v1 = vpop.f32.mrb[5].mxu1  ;;  %v382_v52 = vld [vmem:[#allocation2 + $0x30] sm:$0xff] }
  0xf5   : > { %v1132_v61 = vld [vmem:[#allocation2] sm:$0xff]  ;;  %v792_v63 = vpop.f32.mrb[6].mxu0  ;;  %v1162_v3 = vld [vmem:[#allocation2 + $0xf0] sm:$0xff]  ;;  %v912_v6 = vpop.f32.mrb[6].mxu1 }
  0xf6   : > { %v1197_v2 = vmul.f32 %v3112_v54, %v1132_v61  ;;  %1073 = vst.msk [vmem:[#allocation2 + $0x10] sm:$0xff] %vm317_vm3, %v1014_v57  ;;  %v1015_v4 = vadd.f32 %v792_v63, %v379_v56  ;;  %v2414_v5 = vpop.f32.mrb[7].mxu0  ;;  %v1227_v8 = vmul.f32 %v3112_v54, %v1162_v3  ;;  %1103 = vst.msk [vmem:[#allocation2 + $0x100] sm:$0xff] %vm317_vm3, %v1044_v0  ;;  %v2474_v10 = vpop.f32.mrb[7].mxu1  ;;  %v412_v56 = vld [vmem:[#allocation2 + $0x120] sm:$0xff]  ;;  %v413_v3 = vld [vmem:[#allocation2 + $0x128] sm:$0xff] }
  0xf7   : > { %v1133_v7 = vld [vmem:[#allocation2 + $0x8] sm:$0xff]  ;;  %v1045_v9 = vadd.f32 %v912_v6, %v409_v60  ;;  %v1163_v13 = vld [vmem:[#allocation2 + $0xf8] sm:$0xff] }
  0xf8   : > { %v1262_v11 = vadd.f32 %v3118_v62, %v1197_v2  ;;  %v1198_v12 = vmul.f32 %v3112_v54, %v1133_v7  ;;  %1074 = vst.msk [vmem:[#allocation2 + $0x18] sm:$0xff] %vm317_vm3, %v1015_v4  ;;  %v1292_v14 = vadd.f32 %v3118_v62, %v1227_v8  ;;  %v1228_v15 = vmul.f32 %v3112_v54, %v1163_v13  ;;  %v383_v60 = vld [vmem:[#allocation2 + $0x38] sm:$0xff] }
  0xf9   : > { %1104 = vst.msk [vmem:[#allocation2 + $0x108] sm:$0xff] %vm317_vm3, %v1045_v9 }
  0xfa   : > { %v1320_v17 = vmax.f32 %v1262_v11, 0.0  ;;  %v1263_v18 = vadd.f32 %v3118_v62, %v1198_v12  ;;  %v1350_v20 = vmax.f32 %v1292_v14, 0.0  ;;  %v1293_v21 = vadd.f32 %v3118_v62, %v1228_v15 }
  0xfb   : > { %v797_v22 = vpop.f32.mrb[8].mxu0  ;;  %v917_v28 = vpop.f32.mrb[8].mxu1 }
  0xfc   : > { %v2313_v24 = vpack.c.bf16 %v1320_v17, %v1320_v17  ;;  %v1321_v25 = vmax.f32 %v1263_v18, 0.0  ;;  %v1016_v26 = vadd.f32 %v797_v22, %v380_v16  ;;  %v2417_v27 = vpop.f32.mrb[9].mxu0  ;;  %v2343_v30 = vpack.c.bf16 %v1350_v20, %v1350_v20  ;;  %v2477_v35 = vpop.f32.mrb[9].mxu1 }
  0xfd   : > { %v1351_v31 = vmax.f32 %v1293_v21, 0.0  ;;  %v1134_v32 = vld [vmem:[#allocation2 + $0x10] sm:$0xff]  ;;  %v800_v33 = vpop.f32.mrb[10].mxu0  ;;  %v1046_v34 = vadd.f32 %v917_v28, %v410_v19  ;;  %v1164_v38 = vld [vmem:[#allocation2 + $0x100] sm:$0xff]  ;;  %v920_v41 = vpop.f32.mrb[10].mxu1 }
  0xfe   : > { %1611 = vst.msk [vmem:[%s3135_s20] sm:$0xf] %vm1610_vm5, %v2313_v24  ;;  %v2314_v36 = vpack.c.bf16 %v1321_v25, %v1321_v25  ;;  %v1199_v37 = vmul.f32 %v3112_v54, %v1134_v32  ;;  %v1017_v39 = vadd.f32 %v800_v33, %v381_v23  ;;  %v2418_v40 = vpop.f32.mrb[11].mxu0  ;;  %1641 = vst.msk [vmem:[%s3135_s20 + $0x78] sm:$0xf] %vm1610_vm5, %v2343_v30  ;;  %v2478_v46 = vpop.f32.mrb[11].mxu1 }
  0xff   : > { %1075 = vst.msk [vmem:[#allocation2 + $0x20] sm:$0xff] %vm317_vm3, %v1016_v26  ;;  %v2344_v42 = vpack.c.bf16 %v1351_v31, %v1351_v31  ;;  %v1135_v43 = vld [vmem:[#allocation2 + $0x18] sm:$0xff]  ;;  %v1229_v44 = vmul.f32 %v3112_v54, %v1164_v38  ;;  %1105 = vst.msk [vmem:[#allocation2 + $0x110] sm:$0xff] %vm317_vm3, %v1046_v34  ;;  %v1047_v45 = vadd.f32 %v920_v41, %v411_v29  ;;  %v384_v26 = vld [vmem:[#allocation2 + $0x40] sm:$0xff] }
 0x100   : > { %1612 = vst.msk [vmem:[%s3135_s20 + $0x4] sm:$0xf] %vm1610_vm5, %v2314_v36  ;;  %v1264_v47 = vadd.f32 %v3118_v62, %v1199_v37  ;;  %v1200_v48 = vmul.f32 %v3112_v54, %v1135_v43  ;;  %v1165_v49 = vld [vmem:[#allocation2 + $0x108] sm:$0xff]  ;;  %v414_v29 = vld [vmem:[#allocation2 + $0x130] sm:$0xff] }
 0x101   : > { %1076 = vst.msk [vmem:[#allocation2 + $0x28] sm:$0xff] %vm317_vm3, %v1017_v39  ;;  %v1294_v50 = vadd.f32 %v3118_v62, %v1229_v44  ;;  %v1230_v51 = vmul.f32 %v3112_v54, %v1165_v49  ;;  %1106 = vst.msk [vmem:[#allocation2 + $0x118] sm:$0xff] %vm317_vm3, %v1047_v45  ;;  %v385_v33 = vld [vmem:[#allocation2 + $0x48] sm:$0xff]  ;;  %v415_v39 = vld [vmem:[#allocation2 + $0x138] sm:$0xff] }
 0x102   : > { %1642 = vst.msk [vmem:[%s3135_s20 + $0x7c] sm:$0xf] %vm1610_vm5, %v2344_v42  ;;  %v1322_v53 = vmax.f32 %v1264_v47, 0.0  ;;  %v1265_v55 = vadd.f32 %v3118_v62, %v1200_v48 }
 0x103   : > { %v1352_v57 = vmax.f32 %v1294_v50, 0.0  ;;  %v1295_v58 = vadd.f32 %v3118_v62, %v1230_v51  ;;  %v805_v59 = vpop.f32.mrb[12].mxu0  ;;  %v925_v2 = vpop.f32.mrb[12].mxu1 }
 0x104   : > { %v2315_v61 = vpack.c.bf16 %v1322_v53, %v1322_v53  ;;  %v1323_v63 = vmax.f32 %v1265_v55, 0.0  ;;  %v1018_v0 = vadd.f32 %v805_v59, %v382_v52  ;;  %v2421_v1 = vpop.f32.mrb[13].mxu0  ;;  %v1048_v8 = vadd.f32 %v925_v2, %v412_v56  ;;  %v2481_v9 = vpop.f32.mrb[13].mxu1 }
 0x105   : > { %v2345_v4 = vpack.c.bf16 %v1352_v57, %v1352_v57  ;;  %v1353_v5 = vmax.f32 %v1295_v58, 0.0  ;;  %v808_v7 = vpop.f32.mrb[14].mxu0  ;;  %v928_v15 = vpop.f32.mrb[14].mxu1 }
 0x106   : > { %v1136_v6 = vld [vmem:[#allocation2 + $0x20] sm:$0xff]  ;;  %1613 = vst.msk [vmem:[%s3135_s20 + $0x8] sm:$0xf] %vm1610_vm5, %v2315_v61  ;;  %v2316_v10 = vpack.c.bf16 %v1323_v63, %v1323_v63  ;;  %v1166_v12 = vld [vmem:[#allocation2 + $0x110] sm:$0xff]  ;;  %v1019_v13 = vadd.f32 %v808_v7, %v383_v60  ;;  %v2422_v14 = vpop.f32.mrb[15].mxu0  ;;  %v1049_v19 = vadd.f32 %v928_v15, %v413_v3  ;;  %v2482_v20 = vpop.f32.mrb[15].mxu1 }
 0x107   : > { %v1201_v11 = vmul.f32 %v3112_v54, %v1136_v6  ;;  %1077 = vst.msk [vmem:[#allocation2 + $0x30] sm:$0xff] %vm317_vm3, %v1018_v0  ;;  %v2346_v16 = vpack.c.bf16 %v1353_v5, %v1353_v5  ;;  %v1231_v18 = vmul.f32 %v3112_v54, %v1166_v12  ;;  %1107 = vst.msk [vmem:[#allocation2 + $0x120] sm:$0xff] %vm317_vm3, %v1048_v8  ;;  %v386_v0 = vld [vmem:[#allocation2 + $0x50] sm:$0xff]  ;;  %v416_v3 = vld [vmem:[#allocation2 + $0x140] sm:$0xff] }
 0x108   : > { %1643 = vst.msk [vmem:[%s3135_s20 + $0x80] sm:$0xf] %vm1610_vm5, %v2345_v4  ;;  %v1137_v17 = vld [vmem:[#allocation2 + $0x28] sm:$0xff]  ;;  %1614 = vst.msk [vmem:[%s3135_s20 + $0xc] sm:$0xf] %vm1610_vm5, %v2316_v10  ;;  %v1167_v23 = vld [vmem:[#allocation2 + $0x118] sm:$0xff] }
 0x109   : > { %v1266_v21 = vadd.f32 %v3118_v62, %v1201_v11  ;;  %v1202_v22 = vmul.f32 %v3112_v54, %v1137_v17  ;;  %1078 = vst.msk [vmem:[#allocation2 + $0x38] sm:$0xff] %vm317_vm3, %v1019_v13  ;;  %v1296_v24 = vadd.f32 %v3118_v62, %v1231_v18  ;;  %v1232_v25 = vmul.f32 %v3112_v54, %v1167_v23  ;;  %v387_v7 = vld [vmem:[#allocation2 + $0x58] sm:$0xff]  ;;  %v417_v13 = vld [vmem:[#allocation2 + $0x148] sm:$0xff] }
 0x10a   : > { %1644 = vst.msk [vmem:[%s3135_s20 + $0x84] sm:$0xf] %vm1610_vm5, %v2346_v16 }
 0x10b   : > { %1108 = vst.msk [vmem:[#allocation2 + $0x128] sm:$0xff] %vm317_vm3, %v1049_v19  ;;  %v1324_v27 = vmax.f32 %v1266_v21, 0.0  ;;  %v1267_v28 = vadd.f32 %v3118_v62, %v1202_v22  ;;  %v1354_v30 = vmax.f32 %v1296_v24, 0.0  ;;  %v1297_v31 = vadd.f32 %v3118_v62, %v1232_v25  ;;  %v813_v32 = vpop.f32.mrb[16].mxu0  ;;  %v933_v38 = vpop.f32.mrb[16].mxu1 }
 0x10c   : > { %v1020_v36 = vadd.f32 %v813_v32, %v384_v26  ;;  %v2425_v37 = vpop.f32.mrb[17].mxu0  ;;  %v1050_v44 = vadd.f32 %v933_v38, %v414_v29  ;;  %v2485_v45 = vpop.f32.mrb[17].mxu1 }
 0x10d   : > { %v2317_v34 = vpack.c.bf16 %v1324_v27, %v1324_v27  ;;  %v1325_v35 = vmax.f32 %v1267_v28, 0.0  ;;  %v2347_v40 = vpack.c.bf16 %v1354_v30, %v1354_v30  ;;  %v1355_v41 = vmax.f32 %v1297_v31, 0.0  ;;  %v816_v43 = vpop.f32.mrb[18].mxu0  ;;  %v936_v51 = vpop.f32.mrb[18].mxu1 }
 0x10e   : > { %v1138_v42 = vld [vmem:[#allocation2 + $0x30] sm:$0xff]  ;;  %v1168_v48 = vld [vmem:[#allocation2 + $0x120] sm:$0xff]  ;;  %1079 = vst.msk [vmem:[#allocation2 + $0x40] sm:$0xff] %vm317_vm3, %v1020_v36  ;;  %v1021_v49 = vadd.f32 %v816_v43, %v385_v33  ;;  %v2426_v50 = vpop.f32.mrb[19].mxu0  ;;  %1109 = vst.msk [vmem:[#allocation2 + $0x130] sm:$0xff] %vm317_vm3, %v1050_v44  ;;  %v1051_v56 = vadd.f32 %v936_v51, %v415_v39  ;;  %v2486_v57 = vpop.f32.mrb[19].mxu1 }
 0x10f   : > { %1615 = vst.msk [vmem:[%s3135_s20 + $0x10] sm:$0xf] %vm1610_vm5, %v2317_v34  ;;  %v2318_v46 = vpack.c.bf16 %v1325_v35, %v1325_v35  ;;  %v1203_v47 = vmul.f32 %v3112_v54, %v1138_v42  ;;  %1645 = vst.msk [vmem:[%s3135_s20 + $0x88] sm:$0xf] %vm1610_vm5, %v2347_v40  ;;  %v2348_v52 = vpack.c.bf16 %v1355_v41, %v1355_v41  ;;  %v388_v36 = vld [vmem:[#allocation2 + $0x60] sm:$0xff]  ;;  %v418_v39 = vld [vmem:[#allocation2 + $0x150] sm:$0xff] }
 0x110   : > { %v1139_v53 = vld [vmem:[#allocation2 + $0x38] sm:$0xff]  ;;  %v1233_v55 = vmul.f32 %v3112_v54, %v1168_v48  ;;  %1080 = vst.msk [vmem:[#allocation2 + $0x48] sm:$0xff] %vm317_vm3, %v1021_v49  ;;  %1110 = vst.msk [vmem:[#allocation2 + $0x138] sm:$0xff] %vm317_vm3, %v1051_v56  ;;  %v389_v43 = vld [vmem:[#allocation2 + $0x68] sm:$0xff] }
 0x111   : > { %1616 = vst.msk [vmem:[%s3135_s20 + $0x14] sm:$0xf] %vm1610_vm5, %v2318_v46  ;;  %v1268_v58 = vadd.f32 %v3118_v62, %v1203_v47  ;;  %v1204_v59 = vmul.f32 %v3112_v54, %v1139_v53  ;;  %1646 = vst.msk [vmem:[%s3135_s20 + $0x8c] sm:$0xf] %vm1610_vm5, %v2348_v52  ;;  %v419_v49 = vld [vmem:[#allocation2 + $0x158] sm:$0xff] }
 0x112   : > { %v1169_v60 = vld [vmem:[#allocation2 + $0x128] sm:$0xff]  ;;  %v1298_v61 = vadd.f32 %v3118_v62, %v1233_v55 }
 0x113   : > { %v1234_v63 = vmul.f32 %v3112_v54, %v1169_v60  ;;  %v1326_v1 = vmax.f32 %v1268_v58, 0.0  ;;  %v1269_v2 = vadd.f32 %v3118_v62, %v1204_v59  ;;  %v821_v6 = vpop.f32.mrb[20].mxu0  ;;  %v941_v12 = vpop.f32.mrb[20].mxu1 }
 0x114   : > { %v1356_v4 = vmax.f32 %v1298_v61, 0.0  ;;  %v1022_v10 = vadd.f32 %v821_v6, %v386_v0  ;;  %v2429_v11 = vpop.f32.mrb[21].mxu0  ;;  %v1052_v18 = vadd.f32 %v941_v12, %v416_v3  ;;  %v2489_v19 = vpop.f32.mrb[21].mxu1 }
 0x115   : > { %v1299_v5 = vadd.f32 %v3118_v62, %v1234_v63  ;;  %v2319_v8 = vpack.c.bf16 %v1326_v1, %v1326_v1  ;;  %v1327_v9 = vmax.f32 %v1269_v2, 0.0  ;;  %v1140_v16 = vld [vmem:[#allocation2 + $0x40] sm:$0xff]  ;;  %v824_v17 = vpop.f32.mrb[22].mxu0  ;;  %v1170_v22 = vld [vmem:[#allocation2 + $0x130] sm:$0xff]  ;;  %v944_v25 = vpop.f32.mrb[22].mxu1 }
 0x116   : > { %v2349_v14 = vpack.c.bf16 %v1356_v4, %v1356_v4  ;;  %v1205_v21 = vmul.f32 %v3112_v54, %v1140_v16  ;;  %1081 = vst.msk [vmem:[#allocation2 + $0x50] sm:$0xff] %vm317_vm3, %v1022_v10  ;;  %v1023_v23 = vadd.f32 %v824_v17, %v387_v7  ;;  %v2430_v24 = vpop.f32.mrb[23].mxu0  ;;  %v1235_v28 = vmul.f32 %v3112_v54, %v1170_v22  ;;  %v2490_v30 = vpop.f32.mrb[23].mxu1  ;;  %v390_v10 = vld [vmem:[#allocation2 + $0x70] sm:$0xff]  ;;  %v391_v17 = vld [vmem:[#allocation2 + $0x78] sm:$0xff] }
 0x117   : > { %v1357_v15 = vmax.f32 %v1299_v5, 0.0  ;;  %1617 = vst.msk [vmem:[%s3135_s20 + $0x18] sm:$0xf] %vm1610_vm5, %v2319_v8  ;;  %v2320_v20 = vpack.c.bf16 %v1327_v9, %v1327_v9  ;;  %v1141_v27 = vld [vmem:[#allocation2 + $0x48] sm:$0xff]  ;;  %v1053_v29 = vadd.f32 %v944_v25, %v417_v13  ;;  %v1171_v33 = vld [vmem:[#allocation2 + $0x138] sm:$0xff]  ;;  %v420_v13 = vld [vmem:[#allocation2 + $0x160] sm:$0xff] }
 0x118   : > { %1647 = vst.msk [vmem:[%s3135_s20 + $0x90] sm:$0xf] %vm1610_vm5, %v2349_v14  ;;  %v1270_v31 = vadd.f32 %v3118_v62, %v1205_v21  ;;  %v1206_v32 = vmul.f32 %v3112_v54, %v1141_v27  ;;  %v1300_v34 = vadd.f32 %v3118_v62, %v1235_v28  ;;  %v1236_v35 = vmul.f32 %v3112_v54, %v1171_v33 }
 0x119   : > { %v2350_v26 = vpack.c.bf16 %v1357_v15, %v1357_v15  ;;  %1111 = vst.msk [vmem:[#allocation2 + $0x140] sm:$0xff] %vm317_vm3, %v1052_v18  ;;  %1082 = vst.msk [vmem:[#allocation2 + $0x58] sm:$0xff] %vm317_vm3, %v1023_v23  ;;  %v421_v23 = vld [vmem:[#allocation2 + $0x168] sm:$0xff] }
 0x11a   : > { %1618 = vst.msk [vmem:[%s3135_s20 + $0x1c] sm:$0xf] %vm1610_vm5, %v2320_v20  ;;  %v1328_v37 = vmax.f32 %v1270_v31, 0.0  ;;  %v1271_v38 = vadd.f32 %v3118_v62, %v1206_v32  ;;  %v1358_v40 = vmax.f32 %v1300_v34, 0.0  ;;  %v1301_v41 = vadd.f32 %v3118_v62, %v1236_v35 }
 0x11b   : > { %1648 = vst.msk [vmem:[%s3135_s20 + $0x94] sm:$0xf] %vm1610_vm5, %v2350_v26  ;;  %v829_v42 = vpop.f32.mrb[24].mxu0  ;;  %v949_v48 = vpop.f32.mrb[24].mxu1 }
 0x11c   : > { %1112 = vst.msk [vmem:[#allocation2 + $0x148] sm:$0xff] %vm317_vm3, %v1053_v29  ;;  %v2321_v44 = vpack.c.bf16 %v1328_v37, %v1328_v37  ;;  %v1329_v45 = vmax.f32 %v1271_v38, 0.0  ;;  %v1024_v46 = vadd.f32 %v829_v42, %v388_v36  ;;  %v2433_v47 = vpop.f32.mrb[25].mxu0  ;;  %v2351_v50 = vpack.c.bf16 %v1358_v40, %v1358_v40  ;;  %v2493_v56 = vpop.f32.mrb[25].mxu1 }
 0x11d   : > { %v1359_v51 = vmax.f32 %v1301_v41, 0.0  ;;  %v1142_v52 = vld [vmem:[#allocation2 + $0x50] sm:$0xff]  ;;  %v832_v53 = vpop.f32.mrb[26].mxu0  ;;  %v1054_v55 = vadd.f32 %v949_v48, %v418_v39  ;;  %v952_v63 = vpop.f32.mrb[26].mxu1 }
 0x11e   : > { %1619 = vst.msk [vmem:[%s3135_s20 + $0x20] sm:$0xf] %vm1610_vm5, %v2321_v44  ;;  %v2322_v57 = vpack.c.bf16 %v1329_v45, %v1329_v45  ;;  %v1207_v58 = vmul.f32 %v3112_v54, %v1142_v52  ;;  %v1025_v60 = vadd.f32 %v832_v53, %v389_v43  ;;  %v2434_v61 = vpop.f32.mrb[27].mxu0  ;;  %1649 = vst.msk [vmem:[%s3135_s20 + $0x98] sm:$0xf] %vm1610_vm5, %v2351_v50  ;;  %v2494_v4 = vpop.f32.mrb[27].mxu1 }
 0x11f   : > { %1083 = vst.msk [vmem:[#allocation2 + $0x60] sm:$0xff] %vm317_vm3, %v1024_v46  ;;  %v2352_v0 = vpack.c.bf16 %v1359_v51, %v1359_v51  ;;  %1113 = vst.msk [vmem:[#allocation2 + $0x150] sm:$0xff] %vm317_vm3, %v1054_v55  ;;  %v1055_v3 = vadd.f32 %v952_v63, %v419_v49  ;;  %v392_v46 = vld [vmem:[#allocation2 + $0x80] sm:$0xff]  ;;  %v422_v49 = vld [vmem:[#allocation2 + $0x170] sm:$0xff] }
 0x120   : > { %v1172_v59 = vld [vmem:[#allocation2 + $0x140] sm:$0xff]  ;;  %v1143_v1 = vld [vmem:[#allocation2 + $0x58] sm:$0xff]  ;;  %1620 = vst.msk [vmem:[%s3135_s20 + $0x24] sm:$0xf] %vm1610_vm5, %v2322_v57  ;;  %v1272_v5 = vadd.f32 %v3118_v62, %v1207_v58  ;;  %v393_v53 = vld [vmem:[#allocation2 + $0x88] sm:$0xff] }
 0x121   : > { %v1237_v2 = vmul.f32 %v3112_v54, %v1172_v59  ;;  %v1208_v6 = vmul.f32 %v3112_v54, %v1143_v1  ;;  %1084 = vst.msk [vmem:[#allocation2 + $0x68] sm:$0xff] %vm317_vm3, %v1025_v60  ;;  %1114 = vst.msk [vmem:[#allocation2 + $0x158] sm:$0xff] %vm317_vm3, %v1055_v3  ;;  %v423_v60 = vld [vmem:[#allocation2 + $0x178] sm:$0xff] }
 0x122   : > { %1650 = vst.msk [vmem:[%s3135_s20 + $0x9c] sm:$0xf] %vm1610_vm5, %v2352_v0  ;;  %v1330_v11 = vmax.f32 %v1272_v5, 0.0 }
 0x123   : > { %v1173_v7 = vld [vmem:[#allocation2 + $0x148] sm:$0xff]  ;;  %v1302_v8 = vadd.f32 %v3118_v62, %v1237_v2  ;;  %v1273_v12 = vadd.f32 %v3118_v62, %v1208_v6  ;;  %v837_v16 = vpop.f32.mrb[28].mxu0  ;;  %v957_v22 = vpop.f32.mrb[28].mxu1 }
 0x124   : > { %v1238_v9 = vmul.f32 %v3112_v54, %v1173_v7  ;;  %v2323_v18 = vpack.c.bf16 %v1330_v11, %v1330_v11  ;;  %v1026_v20 = vadd.f32 %v837_v16, %v390_v10  ;;  %v2437_v21 = vpop.f32.mrb[29].mxu0  ;;  %v1056_v28 = vadd.f32 %v957_v22, %v420_v13  ;;  %v2497_v29 = vpop.f32.mrb[29].mxu1 }
 0x125   : > { %v1360_v14 = vmax.f32 %v1302_v8, 0.0  ;;  %v1331_v19 = vmax.f32 %v1273_v12, 0.0  ;;  %v840_v27 = vpop.f32.mrb[30].mxu0  ;;  %v960_v35 = vpop.f32.mrb[30].mxu1 }
 0x126   : > { %v1303_v15 = vadd.f32 %v3118_v62, %v1238_v9  ;;  %v1144_v26 = vld [vmem:[#allocation2 + $0x60] sm:$0xff]  ;;  %1621 = vst.msk [vmem:[%s3135_s20 + $0x28] sm:$0xf] %vm1610_vm5, %v2323_v18  ;;  %v1174_v32 = vld [vmem:[#allocation2 + $0x150] sm:$0xff]  ;;  %v1027_v33 = vadd.f32 %v840_v27, %v391_v17  ;;  %v2438_v34 = vpop.f32.mrb[31].mxu0  ;;  %v1057_v39 = vadd.f32 %v960_v35, %v421_v23  ;;  %v2498_v40 = vpop.f32.mrb[31].mxu1 }
 0x127   : > { %v2353_v24 = vpack.c.bf16 %v1360_v14, %v1360_v14  ;;  %v2324_v30 = vpack.c.bf16 %v1331_v19, %v1331_v19  ;;  %v1209_v31 = vmul.f32 %v3112_v54, %v1144_v26  ;;  %1085 = vst.msk [vmem:[#allocation2 + $0x70] sm:$0xff] %vm317_vm3, %v1026_v20  ;;  %v1239_v38 = vmul.f32 %v3112_v54, %v1174_v32  ;;  %v394_v20 = vld [vmem:[#allocation2 + $0x90] sm:$0xff]  ;;  %v424_v23 = vld [vmem:[#allocation2 + $0x180] sm:$0xff]  ;;  %v395_v27 = vld [vmem:[#allocation2 + $0x98] sm:$0xff] }
 0x128   : > { %v1361_v25 = vmax.f32 %v1303_v15, 0.0  ;;  %v1145_v37 = vld [vmem:[#allocation2 + $0x68] sm:$0xff]  ;;  %1115 = vst.msk [vmem:[#allocation2 + $0x160] sm:$0xff] %vm317_vm3, %v1056_v28  ;;  %v1175_v43 = vld [vmem:[#allocation2 + $0x158] sm:$0xff]  ;;  %1086 = vst.msk [vmem:[#allocation2 + $0x78] sm:$0xff] %vm317_vm3, %v1027_v33 }
 0x129   : > { %1651 = vst.msk [vmem:[%s3135_s20 + $0xa0] sm:$0xf] %vm1610_vm5, %v2353_v24  ;;  %1622 = vst.msk [vmem:[%s3135_s20 + $0x2c] sm:$0xf] %vm1610_vm5, %v2324_v30  ;;  %v1274_v41 = vadd.f32 %v3118_v62, %v1209_v31  ;;  %v1210_v42 = vmul.f32 %v3112_v54, %v1145_v37  ;;  %v1304_v44 = vadd.f32 %v3118_v62, %v1239_v38  ;;  %v425_v33 = vld [vmem:[#allocation2 + $0x188] sm:$0xff] }
 0x12a   : > { %v2354_v36 = vpack.c.bf16 %v1361_v25, %v1361_v25  ;;  %v1240_v45 = vmul.f32 %v3112_v54, %v1175_v43  ;;  %1116 = vst.msk [vmem:[#allocation2 + $0x168] sm:$0xff] %vm317_vm3, %v1057_v39 }
 0x12b   : > { %v1332_v47 = vmax.f32 %v1274_v41, 0.0  ;;  %v1275_v48 = vadd.f32 %v3118_v62, %v1210_v42  ;;  %v1362_v50 = vmax.f32 %v1304_v44, 0.0  ;;  %v845_v52 = vpop.f32.mrb[32].mxu0  ;;  %v965_v59 = vpop.f32.mrb[32].mxu1 }
 0x12c   : > { %1652 = vst.msk [vmem:[%s3135_s20 + $0xa4] sm:$0xf] %vm1610_vm5, %v2354_v36  ;;  %v1305_v51 = vadd.f32 %v3118_v62, %v1240_v45  ;;  %v1028_v57 = vadd.f32 %v845_v52, %v392_v46  ;;  %v2441_v58 = vpop.f32.mrb[33].mxu0  ;;  %v1058_v2 = vadd.f32 %v965_v59, %v422_v49  ;;  %v2501_v3 = vpop.f32.mrb[33].mxu1 }
 0x12d   : > { %v2325_v55 = vpack.c.bf16 %v1332_v47, %v1332_v47  ;;  %v1333_v56 = vmax.f32 %v1275_v48, 0.0  ;;  %v2355_v61 = vpack.c.bf16 %v1362_v50, %v1362_v50  ;;  %v848_v1 = vpop.f32.mrb[34].mxu0  ;;  %v968_v9 = vpop.f32.mrb[34].mxu1 }
 0x12e   : > { %v1363_v63 = vmax.f32 %v1305_v51, 0.0  ;;  %v1146_v0 = vld [vmem:[#allocation2 + $0x70] sm:$0xff]  ;;  %1087 = vst.msk [vmem:[#allocation2 + $0x80] sm:$0xff] %vm317_vm3, %v1028_v57  ;;  %v1029_v7 = vadd.f32 %v848_v1, %v393_v53  ;;  %v2442_v8 = vpop.f32.mrb[35].mxu0  ;;  %1117 = vst.msk [vmem:[#allocation2 + $0x170] sm:$0xff] %vm317_vm3, %v1058_v2  ;;  %v1059_v13 = vadd.f32 %v968_v9, %v423_v60  ;;  %v2502_v14 = vpop.f32.mrb[35].mxu1 }
 0x12f   : > { %1623 = vst.msk [vmem:[%s3135_s20 + $0x30] sm:$0xf] %vm1610_vm5, %v2325_v55  ;;  %v2326_v4 = vpack.c.bf16 %v1333_v56, %v1333_v56  ;;  %v1211_v5 = vmul.f32 %v3112_v54, %v1146_v0  ;;  %v1176_v6 = vld [vmem:[#allocation2 + $0x160] sm:$0xff]  ;;  %1653 = vst.msk [vmem:[%s3135_s20 + $0xa8] sm:$0xf] %vm1610_vm5, %v2355_v61  ;;  %v1147_v11 = vld [vmem:[#allocation2 + $0x78] sm:$0xff] }
 0x130   : > { %v2356_v10 = vpack.c.bf16 %v1363_v63, %v1363_v63  ;;  %v1241_v12 = vmul.f32 %v3112_v54, %v1176_v6  ;;  %v1212_v16 = vmul.f32 %v3112_v54, %v1147_v11  ;;  %1088 = vst.msk [vmem:[#allocation2 + $0x88] sm:$0xff] %vm317_vm3, %v1029_v7  ;;  %1118 = vst.msk [vmem:[#allocation2 + $0x178] sm:$0xff] %vm317_vm3, %v1059_v13  ;;  %v396_v57 = vld [vmem:[#allocation2 + $0xa0] sm:$0xff]  ;;  %v426_v60 = vld [vmem:[#allocation2 + $0x190] sm:$0xff] }
 0x131   : > { %1624 = vst.msk [vmem:[%s3135_s20 + $0x34] sm:$0xf] %vm1610_vm5, %v2326_v4  ;;  %v1276_v15 = vadd.f32 %v3118_v62, %v1211_v5  ;;  %v1177_v17 = vld [vmem:[#allocation2 + $0x168] sm:$0xff]  ;;  %v427_v7 = vld [vmem:[#allocation2 + $0x198] sm:$0xff] }
 0x132   : > { %1654 = vst.msk [vmem:[%s3135_s20 + $0xac] sm:$0xf] %vm1610_vm5, %v2356_v10  ;;  %v1306_v18 = vadd.f32 %v3118_v62, %v1241_v12  ;;  %v1242_v19 = vmul.f32 %v3112_v54, %v1177_v17  ;;  %v1277_v22 = vadd.f32 %v3118_v62, %v1212_v16  ;;  %v397_v1 = vld [vmem:[#allocation2 + $0xa8] sm:$0xff] }
 0x133   : > { %v1334_v21 = vmax.f32 %v1276_v15, 0.0  ;;  %v853_v26 = vpop.f32.mrb[36].mxu0  ;;  %v973_v32 = vpop.f32.mrb[36].mxu1 }
 0x134   : > { %v1364_v24 = vmax.f32 %v1306_v18, 0.0  ;;  %v1307_v25 = vadd.f32 %v3118_v62, %v1242_v19  ;;  %v1335_v29 = vmax.f32 %v1277_v22, 0.0  ;;  %v1030_v30 = vadd.f32 %v853_v26, %v394_v20  ;;  %v2445_v31 = vpop.f32.mrb[37].mxu0  ;;  %v2505_v39 = vpop.f32.mrb[37].mxu1 }
 0x135   : > { %v2327_v28 = vpack.c.bf16 %v1334_v21, %v1334_v21  ;;  %v1148_v36 = vld [vmem:[#allocation2 + $0x80] sm:$0xff]  ;;  %v856_v37 = vpop.f32.mrb[38].mxu0  ;;  %v1060_v38 = vadd.f32 %v973_v32, %v424_v23  ;;  %v1178_v42 = vld [vmem:[#allocation2 + $0x170] sm:$0xff]  ;;  %v976_v45 = vpop.f32.mrb[38].mxu1 }
 0x136   : > { %v2357_v34 = vpack.c.bf16 %v1364_v24, %v1364_v24  ;;  %v1365_v35 = vmax.f32 %v1307_v25, 0.0  ;;  %v2328_v40 = vpack.c.bf16 %v1335_v29, %v1335_v29  ;;  %v1213_v41 = vmul.f32 %v3112_v54, %v1148_v36  ;;  %1089 = vst.msk [vmem:[#allocation2 + $0x90] sm:$0xff] %vm317_vm3, %v1030_v30  ;;  %v2446_v44 = vpop.f32.mrb[39].mxu0  ;;  %v2506_v50 = vpop.f32.mrb[39].mxu1  ;;  %v398_v30 = vld [vmem:[#allocation2 + $0xb0] sm:$0xff] }
 0x137   : > { %1625 = vst.msk [vmem:[%s3135_s20 + $0x38] sm:$0xf] %vm1610_vm5, %v2327_v28  ;;  %v1031_v43 = vadd.f32 %v856_v37, %v395_v27  ;;  %v1149_v47 = vld [vmem:[#allocation2 + $0x88] sm:$0xff]  ;;  %v1243_v48 = vmul.f32 %v3112_v54, %v1178_v42  ;;  %v1061_v49 = vadd.f32 %v976_v45, %v425_v33  ;;  %v1179_v53 = vld [vmem:[#allocation2 + $0x178] sm:$0xff]  ;;  %v428_v33 = vld [vmem:[#allocation2 + $0x1a0] sm:$0xff] }
 0x138   : > { %1655 = vst.msk [vmem:[%s3135_s20 + $0xb0] sm:$0xf] %vm1610_vm5, %v2357_v34  ;;  %v2358_v46 = vpack.c.bf16 %v1365_v35, %v1365_v35  ;;  %1626 = vst.msk [vmem:[%s3135_s20 + $0x3c] sm:$0xf] %vm1610_vm5, %v2328_v40  ;;  %v1278_v51 = vadd.f32 %v3118_v62, %v1213_v41  ;;  %v1214_v52 = vmul.f32 %v3112_v54, %v1149_v47  ;;  %v399_v37 = vld [vmem:[#allocation2 + $0xb8] sm:$0xff] }
 0x139   : > { %1119 = vst.msk [vmem:[#allocation2 + $0x180] sm:$0xff] %vm317_vm3, %v1060_v38  ;;  %1090 = vst.msk [vmem:[#allocation2 + $0x98] sm:$0xff] %vm317_vm3, %v1031_v43  ;;  %v1308_v55 = vadd.f32 %v3118_v62, %v1243_v48  ;;  %v1244_v56 = vmul.f32 %v3112_v54, %v1179_v53  ;;  %v429_v43 = vld [vmem:[#allocation2 + $0x1a8] sm:$0xff] }
 0x13a   : > { %1656 = vst.msk [vmem:[%s3135_s20 + $0xb4] sm:$0xf] %vm1610_vm5, %v2358_v46  ;;  %v1336_v58 = vmax.f32 %v1278_v51, 0.0  ;;  %v1279_v59 = vadd.f32 %v3118_v62, %v1214_v52 }
 0x13b   : > { %1120 = vst.msk [vmem:[#allocation2 + $0x188] sm:$0xff] %vm317_vm3, %v1061_v49  ;;  %v1366_v61 = vmax.f32 %v1308_v55, 0.0  ;;  %v1309_v63 = vadd.f32 %v3118_v62, %v1244_v56  ;;  %v861_v0 = vpop.f32.mrb[40].mxu0  ;;  %v981_v6 = vpop.f32.mrb[40].mxu1 }
 0x13c   : > { %v2329_v2 = vpack.c.bf16 %v1336_v58, %v1336_v58  ;;  %v1337_v3 = vmax.f32 %v1279_v59, 0.0  ;;  %v1032_v4 = vadd.f32 %v861_v0, %v396_v57  ;;  %v2449_v5 = vpop.f32.mrb[41].mxu0  ;;  %v1062_v12 = vadd.f32 %v981_v6, %v426_v60  ;;  %v2509_v13 = vpop.f32.mrb[41].mxu1 }
 0x13d   : > { %v2359_v8 = vpack.c.bf16 %v1366_v61, %v1366_v61  ;;  %v1367_v9 = vmax.f32 %v1309_v63, 0.0  ;;  %v1150_v10 = vld [vmem:[#allocation2 + $0x90] sm:$0xff]  ;;  %v864_v11 = vpop.f32.mrb[42].mxu0  ;;  %v984_v19 = vpop.f32.mrb[42].mxu1 }
 0x13e   : > { %1627 = vst.msk [vmem:[%s3135_s20 + $0x40] sm:$0xf] %vm1610_vm5, %v2329_v2  ;;  %v2330_v14 = vpack.c.bf16 %v1337_v3, %v1337_v3  ;;  %v1215_v15 = vmul.f32 %v3112_v54, %v1150_v10  ;;  %v1033_v17 = vadd.f32 %v864_v11, %v397_v1  ;;  %v2450_v18 = vpop.f32.mrb[43].mxu0  ;;  %v1063_v23 = vadd.f32 %v984_v19, %v427_v7  ;;  %v2510_v24 = vpop.f32.mrb[43].mxu1  ;;  %v430_v7 = vld [vmem:[#allocation2 + $0x1b0] sm:$0xff]  ;;  %v401_v11 = vld [vmem:[#allocation2 + $0xc8] sm:$0xff] }
 0x13f   : > { %1091 = vst.msk [vmem:[#allocation2 + $0xa0] sm:$0xff] %vm317_vm3, %v1032_v4  ;;  %v2360_v20 = vpack.c.bf16 %v1367_v9, %v1367_v9  ;;  %1121 = vst.msk [vmem:[#allocation2 + $0x190] sm:$0xff] %vm317_vm3, %v1062_v12  ;;  %v400_v4 = vld [vmem:[#allocation2 + $0xc0] sm:$0xff] }
 0x140   : > { %v1180_v16 = vld [vmem:[#allocation2 + $0x180] sm:$0xff]  ;;  %1657 = vst.msk [vmem:[%s3135_s20 + $0xb8] sm:$0xf] %vm1610_vm5, %v2359_v8  ;;  %v1151_v21 = vld [vmem:[#allocation2 + $0x98] sm:$0xff]  ;;  %1628 = vst.msk [vmem:[%s3135_s20 + $0x44] sm:$0xf] %vm1610_vm5, %v2330_v14  ;;  %v1280_v25 = vadd.f32 %v3118_v62, %v1215_v15 }
 0x141   : > { %v1245_v22 = vmul.f32 %v3112_v54, %v1180_v16  ;;  %v1216_v26 = vmul.f32 %v3112_v54, %v1151_v21  ;;  %1092 = vst.msk [vmem:[#allocation2 + $0xa8] sm:$0xff] %vm317_vm3, %v1033_v17  ;;  %1122 = vst.msk [vmem:[#allocation2 + $0x198] sm:$0xff] %vm317_vm3, %v1063_v23  ;;  %v431_v17 = vld [vmem:[#allocation2 + $0x1b8] sm:$0xff] }
 0x142   : > { %v1181_v27 = vld [vmem:[#allocation2 + $0x188] sm:$0xff]  ;;  %1658 = vst.msk [vmem:[%s3135_s20 + $0xbc] sm:$0xf] %vm1610_vm5, %v2360_v20  ;;  %v1338_v31 = vmax.f32 %v1280_v25, 0.0 }
 0x143   : > { %v1310_v28 = vadd.f32 %v3118_v62, %v1245_v22  ;;  %v1246_v29 = vmul.f32 %v3112_v54, %v1181_v27  ;;  %v1281_v32 = vadd.f32 %v3118_v62, %v1216_v26  ;;  %v869_v36 = vpop.f32.mrb[44].mxu0  ;;  %v989_v42 = vpop.f32.mrb[44].mxu1 }
 0x144   : > { %v2331_v38 = vpack.c.bf16 %v1338_v31, %v1338_v31  ;;  %v1034_v40 = vadd.f32 %v869_v36, %v398_v30  ;;  %v2453_v41 = vpop.f32.mrb[45].mxu0  ;;  %v1064_v48 = vadd.f32 %v989_v42, %v428_v33  ;;  %v2513_v49 = vpop.f32.mrb[45].mxu1 }
 0x145   : > { %v1368_v34 = vmax.f32 %v1310_v28, 0.0  ;;  %v1311_v35 = vadd.f32 %v3118_v62, %v1246_v29  ;;  %v1339_v39 = vmax.f32 %v1281_v32, 0.0  ;;  %v872_v47 = vpop.f32.mrb[46].mxu0  ;;  %v992_v56 = vpop.f32.mrb[46].mxu1  ;;  %v402_v41 = vld [vmem:[#allocation2 + $0xd0] sm:$0xff] }
 0x146   : > { %v1152_v46 = vld [vmem:[#allocation2 + $0xa0] sm:$0xff]  ;;  %1629 = vst.msk [vmem:[%s3135_s20 + $0x48] sm:$0xf] %vm1610_vm5, %v2331_v38  ;;  %v1182_v52 = vld [vmem:[#allocation2 + $0x190] sm:$0xff]  ;;  %v1035_v53 = vadd.f32 %v872_v47, %v399_v37  ;;  %v2454_v55 = vpop.f32.mrb[47].mxu0  ;;  %v1065_v60 = vadd.f32 %v992_v56, %v429_v43  ;;  %v2514_v61 = vpop.f32.mrb[47].mxu1 }
 0x147   : > { %v2361_v44 = vpack.c.bf16 %v1368_v34, %v1368_v34  ;;  %v1369_v45 = vmax.f32 %v1311_v35, 0.0  ;;  %v2332_v50 = vpack.c.bf16 %v1339_v39, %v1339_v39  ;;  %v1217_v51 = vmul.f32 %v3112_v54, %v1152_v46  ;;  %1093 = vst.msk [vmem:[#allocation2 + $0xb0] sm:$0xff] %vm317_vm3, %v1034_v40  ;;  %1123 = vst.msk [vmem:[#allocation2 + $0x1a0] sm:$0xff] %vm317_vm3, %v1064_v48  ;;  %v3356_v39 = vld [vmem:[%s3610_s2] ss:$0 sm:$0xff]  ;;  %v403_v48 = vld [vmem:[#allocation2 + $0xd8] sm:$0xff] }
 0x148   : > { %v1153_v58 = vld [vmem:[#allocation2 + $0xa8] sm:$0xff]  ;;  %v1247_v59 = vmul.f32 %v3112_v54, %v1182_v52  ;;  %v1183_v1 = vld [vmem:[#allocation2 + $0x198] sm:$0xff]  ;;  %1094 = vst.msk [vmem:[#allocation2 + $0xb8] sm:$0xff] %vm317_vm3, %v1035_v53  ;;  %1124 = vst.msk [vmem:[#allocation2 + $0x1a8] sm:$0xff] %vm317_vm3, %v1065_v60 }
 0x149   : > { %1659 = vst.msk [vmem:[%s3135_s20 + $0xc0] sm:$0xf] %vm1610_vm5, %v2361_v44  ;;  %v2362_v57 = vpack.c.bf16 %v1369_v45, %v1369_v45  ;;  %1630 = vst.msk [vmem:[%s3135_s20 + $0x4c] sm:$0xf] %vm1610_vm5, %v2332_v50  ;;  %v1282_v63 = vadd.f32 %v3118_v62, %v1217_v51  ;;  %v1218_v0 = vmul.f32 %v3112_v54, %v1153_v58  ;;  %v432_v43 = vld [vmem:[#allocation2 + $0x1c0] sm:$0xff]  ;;  %v433_v55 = vld [vmem:[#allocation2 + $0x1c8] sm:$0xff] }
 0x14a   : > { %v1312_v2 = vadd.f32 %v3118_v62, %v1247_v59  ;;  %v1248_v3 = vmul.f32 %v3112_v54, %v1183_v1  ;;  %v3364_v45 = vld [vmem:[%s3611_s3] ss:$0 sm:$0xff] }
 0x14b   : > { %1660 = vst.msk [vmem:[%s3135_s20 + $0xc4] sm:$0xf] %vm1610_vm5, %v2362_v57  ;;  %v1340_v5 = vmax.f32 %v1282_v63, 0.0  ;;  %v1283_v6 = vadd.f32 %v3118_v62, %v1218_v0  ;;  %v877_v10 = vpop.f32.mrb[48].mxu0  ;;  %v997_v16 = vpop.f32.mrb[48].mxu1 }
 0x14c   : > { %v1370_v8 = vmax.f32 %v1312_v2, 0.0  ;;  %v1313_v9 = vadd.f32 %v3118_v62, %v1248_v3  ;;  %v1036_v14 = vadd.f32 %v877_v10, %v400_v4  ;;  %v2457_v15 = vpop.f32.mrb[49].mxu0  ;;  %v1066_v22 = vadd.f32 %v997_v16, %v430_v7  ;;  %v2517_v23 = vpop.f32.mrb[49].mxu1 }
 0x14d   : > { %v2333_v12 = vpack.c.bf16 %v1340_v5, %v1340_v5  ;;  %v1341_v13 = vmax.f32 %v1283_v6, 0.0  ;;  %v880_v21 = vpop.f32.mrb[50].mxu0  ;;  %v1000_v29 = vpop.f32.mrb[50].mxu1 }
 0x14e   : > { %v2363_v18 = vpack.c.bf16 %v1370_v8, %v1370_v8  ;;  %v1371_v19 = vmax.f32 %v1313_v9, 0.0  ;;  %v1154_v20 = vld [vmem:[#allocation2 + $0xb0] sm:$0xff]  ;;  %v1184_v26 = vld [vmem:[#allocation2 + $0x1a0] sm:$0xff]  ;;  %1095 = vst.msk [vmem:[#allocation2 + $0xc0] sm:$0xff] %vm317_vm3, %v1036_v14  ;;  %v1037_v27 = vadd.f32 %v880_v21, %v401_v11  ;;  %v2458_v28 = vpop.f32.mrb[51].mxu0  ;;  %1125 = vst.msk [vmem:[#allocation2 + $0x1b0] sm:$0xff] %vm317_vm3, %v1066_v22  ;;  %v1067_v33 = vadd.f32 %v1000_v29, %v431_v17 }
 0x14f   : > { %1631 = vst.msk [vmem:[%s3135_s20 + $0x50] sm:$0xf] %vm1610_vm5, %v2333_v12  ;;  %v2334_v24 = vpack.c.bf16 %v1341_v13, %v1341_v13  ;;  %v1219_v25 = vmul.f32 %v3112_v54, %v1154_v20  ;;  %v1155_v31 = vld [vmem:[#allocation2 + $0xb8] sm:$0xff]  ;;  %v1249_v32 = vmul.f32 %v3112_v54, %v1184_v26  ;;  %v2518_v34 = vpop.f32.mrb[51].mxu1  ;;  %v1185_v37 = vld [vmem:[#allocation2 + $0x1a8] sm:$0xff]  ;;  %v404_v14 = vld [vmem:[#allocation2 + $0xe0] sm:$0xff] }
 0x150   : > { %1661 = vst.msk [vmem:[%s3135_s20 + $0xc8] sm:$0xf] %vm1610_vm5, %v2363_v18  ;;  %v2364_v30 = vpack.c.bf16 %v1371_v19, %v1371_v19  ;;  %v1220_v36 = vmul.f32 %v3112_v54, %v1155_v31  ;;  %v1250_v40 = vmul.f32 %v3356_v39, %v1185_v37  ;;  %v405_v20 = vld [vmem:[#allocation2 + $0xe8] sm:$0xff] }
 0x151   : > { %1632 = vst.msk [vmem:[%s3135_s20 + $0x54] sm:$0xf] %vm1610_vm5, %v2334_v24  ;;  %v1284_v35 = vadd.f32 %v3118_v62, %v1219_v25  ;;  %v1314_v38 = vadd.f32 %v3118_v62, %v1249_v32 }
 0x152   : > { %1096 = vst.msk [vmem:[#allocation2 + $0xc8] sm:$0xff] %vm317_vm3, %v1037_v27  ;;  %1126 = vst.msk [vmem:[#allocation2 + $0x1b8] sm:$0xff] %vm317_vm3, %v1067_v33  ;;  %v1285_v54 = vadd.f32 %v3118_v62, %v1220_v36  ;;  %v1315_v46 = vadd.f32 %v3364_v45, %v1250_v40 }
 0x153   : > { %1662 = vst.msk [vmem:[%s3135_s20 + $0xcc] sm:$0xf] %vm1610_vm5, %v2364_v30  ;;  %v1342_v42 = vmax.f32 %v1284_v35, 0.0  ;;  %v1372_v44 = vmax.f32 %v1314_v38, 0.0  ;;  %v885_v47 = vpop.f32.mrb[52].mxu0  ;;  %v1005_v53 = vpop.f32.mrb[52].mxu1 }
 0x154   : > { %v1343_v50 = vmax.f32 %v1285_v54, 0.0  ;;  %v1038_v51 = vadd.f32 %v885_v47, %v402_v41  ;;  %v2461_v52 = vpop.f32.mrb[53].mxu0  ;;  %v1373_v56 = vmax.f32 %v1315_v46, 0.0  ;;  %v1068_v59 = vadd.f32 %v1005_v53, %v432_v43  ;;  %v2521_v60 = vpop.f32.mrb[53].mxu1 }
 0x155   : > { %v2335_v49 = vpack.c.bf16 %v1342_v42, %v1342_v42  ;;  %v2365_v62 = vpack.c.bf16 %v1372_v44, %v1372_v44  ;;  %v1156_v57 = vld [vmem:[#allocation2 + $0xc0] sm:$0xff]  ;;  %v888_v58 = vpop.f32.mrb[54].mxu0  ;;  %v1186_v0 = vld [vmem:[#allocation2 + $0x1b0] sm:$0xff]  ;;  %v1008_v3 = vpop.f32.mrb[54].mxu1 }
 0x156   : > { %v2336_v61 = vpack.c.bf16 %v1343_v50, %v1343_v50  ;;  %v1221_v63 = vmul.f32 %v3356_v39, %v1156_v57  ;;  %1097 = vst.msk [vmem:[#allocation2 + $0xd0] sm:$0xff] %vm317_vm3, %v1038_v51  ;;  %v1039_v1 = vadd.f32 %v888_v58, %v403_v48  ;;  %v2462_v2 = vpop.f32.mrb[55].mxu0  ;;  %v2366_v4 = vpack.c.bf16 %v1373_v56, %v1373_v56  ;;  %v2522_v8 = vpop.f32.mrb[55].mxu1 }
 0x157   : > { %1633 = vst.msk [vmem:[%s3135_s20 + $0x58] sm:$0xf] %vm1610_vm5, %v2335_v49  ;;  %1663 = vst.msk [vmem:[%s3135_s20 + $0xd0] sm:$0xf] %vm1610_vm5, %v2365_v62  ;;  %v1251_v6 = vmul.f32 %v3356_v39, %v1186_v0  ;;  %v1069_v7 = vadd.f32 %v1008_v3, %v433_v55 }
 0x158   : > { %1127 = vst.msk [vmem:[#allocation2 + $0x1c0] sm:$0xff] %vm317_vm3, %v1068_v59  ;;  %v1286_v9 = vadd.f32 %v3364_v45, %v1221_v63  ;;  %1098 = vst.msk [vmem:[#allocation2 + $0xd8] sm:$0xff] %vm317_vm3, %v1039_v1 }
 0x159   : > { %v1157_v5 = vld [vmem:[#allocation2 + $0xc8] sm:$0xff]  ;;  %1634 = vst.msk [vmem:[%s3135_s20 + $0x5c] sm:$0xf] %vm1610_vm5, %v2336_v61  ;;  %v1187_v11 = vld [vmem:[#allocation2 + $0x1b8] sm:$0xff]  ;;  %1664 = vst.msk [vmem:[%s3135_s20 + $0xd4] sm:$0xf] %vm1610_vm5, %v2366_v4  ;;  %v1316_v12 = vadd.f32 %v3364_v45, %v1251_v6 }
 0x15a   : > { %v1222_v10 = vmul.f32 %v3356_v39, %v1157_v5  ;;  %v1252_v13 = vmul.f32 %v3356_v39, %v1187_v11  ;;  %1128 = vst.msk [vmem:[#allocation2 + $0x1c8] sm:$0xff] %vm317_vm3, %v1069_v7  ;;  %v1344_v15 = vmax.f32 %v1286_v9, 0.0 }
 0x15b   : > { %v1374_v17 = vmax.f32 %v1316_v12, 0.0  ;;  %v893_v19 = vpop.f32.mrb[56].mxu0 }
 0x15c   : > { %v1287_v16 = vadd.f32 %v3364_v45, %v1222_v10  ;;  %v1317_v18 = vadd.f32 %v3364_v45, %v1252_v13  ;;  %v2337_v21 = vpack.c.bf16 %v1344_v15, %v1344_v15  ;;  %v1040_v23 = vadd.f32 %v893_v19, %v404_v14  ;;  %v2465_v24 = vpop.f32.mrb[57].mxu0 }
 0x15d   : > { %v2367_v25 = vpack.c.bf16 %v1374_v17, %v1374_v17  ;;  %v1158_v27 = vld [vmem:[#allocation2 + $0xd0] sm:$0xff]  ;;  %v896_v28 = vpop.f32.mrb[58].mxu0 }
 0x15e   : > { %v1345_v22 = vmax.f32 %v1287_v16, 0.0  ;;  %v1375_v26 = vmax.f32 %v1317_v18, 0.0  ;;  %1635 = vst.msk [vmem:[%s3135_s20 + $0x60] sm:$0xf] %vm1610_vm5, %v2337_v21  ;;  %v1223_v30 = vmul.f32 %v3356_v39, %v1158_v27  ;;  %v1041_v32 = vadd.f32 %v896_v28, %v405_v20  ;;  %v2466_v33 = vpop.f32.mrb[59].mxu0 }
 0x15f   : > { %v1188_v31 = vld [vmem:[#allocation2 + $0x1c0] sm:$0xff]  ;;  %1099 = vst.msk [vmem:[#allocation2 + $0xe0] sm:$0xff] %vm317_vm3, %v1040_v23  ;;  %v1159_v35 = vld [vmem:[#allocation2 + $0xd8] sm:$0xff] }
 0x160   : > { %v2338_v29 = vpack.c.bf16 %v1345_v22, %v1345_v22  ;;  %1665 = vst.msk [vmem:[%s3135_s20 + $0xd8] sm:$0xf] %vm1610_vm5, %v2367_v25  ;;  %v2368_v34 = vpack.c.bf16 %v1375_v26, %v1375_v26  ;;  %v1253_v36 = vmul.f32 %v3356_v39, %v1188_v31  ;;  %v1288_v37 = vadd.f32 %v3364_v45, %v1223_v30 }
 0x161   : > { %v1224_v38 = vmul.f32 %v3356_v39, %v1159_v35  ;;  %v1189_v40 = vld [vmem:[#allocation2 + $0x1c8] sm:$0xff]  ;;  %1100 = vst.msk [vmem:[#allocation2 + $0xe8] sm:$0xff] %vm317_vm3, %v1041_v32 }
 0x162   : > { %1636 = vst.msk [vmem:[%s3135_s20 + $0x64] sm:$0xf] %vm1610_vm5, %v2338_v29  ;;  %1666 = vst.msk [vmem:[%s3135_s20 + $0xdc] sm:$0xf] %vm1610_vm5, %v2368_v34  ;;  %v1318_v41 = vadd.f32 %v3364_v45, %v1253_v36  ;;  %v1254_v42 = vmul.f32 %v3356_v39, %v1189_v40  ;;  %v1346_v54 = vmax.f32 %v1288_v37, 0.0 }
 0x163   : > { %v1289_v43 = vadd.f32 %v3364_v45, %v1224_v38 }
 0x164   : > { %v1376_v44 = vmax.f32 %v1318_v41, 0.0  ;;  %v1319_v46 = vadd.f32 %v3364_v45, %v1254_v42  ;;  %v2339_v47 = vpack.c.bf16 %v1346_v54, %v1346_v54 }
 0x165   : > { %v1347_v48 = vmax.f32 %v1289_v43, 0.0 }
 0x166   : > { %v2369_v49 = vpack.c.bf16 %v1376_v44, %v1376_v44  ;;  %v1377_v50 = vmax.f32 %v1319_v46, 0.0  ;;  %v1160_v51 = vld [vmem:[#allocation2 + $0xe0] sm:$0xff]  ;;  %1637 = vst.msk [vmem:[%s3135_s20 + $0x68] sm:$0xf] %vm1610_vm5, %v2339_v47 }
 0x167   : > { %v2340_v52 = vpack.c.bf16 %v1347_v48, %v1347_v48  ;;  %v1225_v53 = vmul.f32 %v3356_v39, %v1160_v51 }
 0x168   : > { %1667 = vst.msk [vmem:[%s3135_s20 + $0xe0] sm:$0xf] %vm1610_vm5, %v2369_v49  ;;  %v2370_v55 = vpack.c.bf16 %v1377_v50, %v1377_v50  ;;  %v1161_v62 = vld [vmem:[#allocation2 + $0xe8] sm:$0xff] }
 0x169   : > { %1638 = vst.msk [vmem:[%s3135_s20 + $0x6c] sm:$0xf] %vm1610_vm5, %v2340_v52  ;;  %v1290_v56 = vadd.f32 %v3364_v45, %v1225_v53  ;;  %v1226_v57 = vmul.f32 %v3356_v39, %v1161_v62 }
 0x16a   : > { %1668 = vst.msk [vmem:[%s3135_s20 + $0xe4] sm:$0xf] %vm1610_vm5, %v2370_v55 }
 0x16b   : > { %v1348_v58 = vmax.f32 %v1290_v56, 0.0  ;;  %v1291_v59 = vadd.f32 %v3364_v45, %v1226_v57  ;;  %1675 = sbr.rel (!%p2837_p3) target bundleno = 470 (0x1d6), region = 48 }
 0x16d   : > { %v2341_v60 = vpack.c.bf16 %v1348_v58, %v1348_v58  ;;  %v1349_v61 = vmax.f32 %v1291_v59, 0.0 }
 0x16f   : > { %1639 = vst.msk [vmem:[%s3135_s20 + $0x70] sm:$0xf] %vm1610_vm5, %v2341_v60  ;;  %v2342_v63 = vpack.c.bf16 %v1349_v61, %v1349_v61 }
 0x171   : > { %1640 = vst.msk [vmem:[%s3135_s20 + $0x74] sm:$0xf] %vm1610_vm5, %v2342_v63 }
 0x172   : > { %s3624_s28 = smov (!%p1678_p9, %s1677_s28), 58 }
 0x173   : > { %s2301_s8 = sshll.u32 %s3624_s28, 6 }
 0x174   : > { %p2304_p10 = scmp.eq.s32.totalorder %s2301_s8, 0 }
 0x175   : > { %2669 = sdivrem.u32 (!%p2304_p10), %s3624_s28, 58 }
 0x176   : > { %1687 = sbr.rel (%p2304_p10) target bundleno = 470 (0x1d6), region = 52 }
 0x17e   : > { %s3434_s23 = spop.drf %2669 }
 0x17f   : > { %p2305_p11 = scmp.le.s32.totalorder %s3434_s23, 0 }
 0x180   : > { %s3614_s17 = smov (!%p2305_p11), %s3428_s7  ;;  %s3615_s30 = smov (!%p2305_p11), %s3135_s20 }
 0x181   : > { %2090 = sbr.rel (%p2305_p11) target bundleno = 441 (0x1b9), region = 133  ;;  %s3443_s9 = smov (!%p2305_p11), 0  }
 0x182   : > { %s3445_s10 = smov (!%p2305_p11), 0  }
 0x188 LB: >> { %v1704_v39 = vld [vmem:[%s2751_s30] sm:$0xf]  ;;  %v1706_v45 = vld [vmem:[%s2751_s30 + $0x4] sm:$0xf]  ;;  %v1708_v0 = vld [vmem:[%s2751_s30 + $0x8] sm:$0xf]  ;;  %s2759_s10 = sphi %s3445_s10, %s1698_s10   ;;  %s2755_s9 = sphi %s3443_s9, %s3616_s9   ;;  %s2751_s30 = sphi %s3615_s30, %s1825_s30   ;;  %s2747_s17 = sphi %s3614_s17, %s1826_s17  }
 0x189   : >> { %1705 = vst [vmem:[%s2747_s17] sm:$0xf] %v1704_v39  ;;  %1707 = vst [vmem:[%s2747_s17 + $0x4] sm:$0xf] %v1706_v45  ;;  %v1710_v1 = vld [vmem:[%s2751_s30 + $0xc] sm:$0xf]  ;;  %s1820_s11 = sadd.s32 1, %s2755_s9 }
 0x18a   : >> { %1709 = vst [vmem:[%s2747_s17 + $0x8] sm:$0xf] %v1708_v0  ;;  %v1712_v2 = vld [vmem:[%s2751_s30 + $0x10] sm:$0xf]  ;;  %v1714_v3 = vld [vmem:[%s2751_s30 + $0x14] sm:$0xf]  ;;  %p1821_p12 = scmp.ge.s32.totalorder %s1820_s11, %s3434_s23 }
 0x18b   : >> { %1711 = vst [vmem:[%s2747_s17 + $0xc] sm:$0xf] %v1710_v1  ;;  %1713 = vst [vmem:[%s2747_s17 + $0x10] sm:$0xf] %v1712_v2  ;;  %v1716_v4 = vld [vmem:[%s2751_s30 + $0x18] sm:$0xf] }
 0x18c   : >> { %1715 = vst [vmem:[%s2747_s17 + $0x14] sm:$0xf] %v1714_v3  ;;  %v1718_v5 = vld [vmem:[%s2751_s30 + $0x1c] sm:$0xf]  ;;  %v1720_v6 = vld [vmem:[%s2751_s30 + $0x20] sm:$0xf] }
 0x18d   : >> { %1717 = vst [vmem:[%s2747_s17 + $0x18] sm:$0xf] %v1716_v4  ;;  %1719 = vst [vmem:[%s2747_s17 + $0x1c] sm:$0xf] %v1718_v5  ;;  %v1722_v7 = vld [vmem:[%s2751_s30 + $0x24] sm:$0xf] }
 0x18e   : >> { %1721 = vst [vmem:[%s2747_s17 + $0x20] sm:$0xf] %v1720_v6  ;;  %v1724_v8 = vld [vmem:[%s2751_s30 + $0x28] sm:$0xf]  ;;  %v1726_v9 = vld [vmem:[%s2751_s30 + $0x2c] sm:$0xf] }
 0x18f   : >> { %1723 = vst [vmem:[%s2747_s17 + $0x24] sm:$0xf] %v1722_v7  ;;  %1725 = vst [vmem:[%s2747_s17 + $0x28] sm:$0xf] %v1724_v8  ;;  %v1728_v10 = vld [vmem:[%s2751_s30 + $0x30] sm:$0xf] }
 0x190   : >> { %1727 = vst [vmem:[%s2747_s17 + $0x2c] sm:$0xf] %v1726_v9  ;;  %v1730_v11 = vld [vmem:[%s2751_s30 + $0x34] sm:$0xf]  ;;  %v1732_v12 = vld [vmem:[%s2751_s30 + $0x38] sm:$0xf] }
 0x191   : >> { %1729 = vst [vmem:[%s2747_s17 + $0x30] sm:$0xf] %v1728_v10  ;;  %1731 = vst [vmem:[%s2747_s17 + $0x34] sm:$0xf] %v1730_v11  ;;  %v1734_v13 = vld [vmem:[%s2751_s30 + $0x3c] sm:$0xf] }
 0x192   : >> { %1733 = vst [vmem:[%s2747_s17 + $0x38] sm:$0xf] %v1732_v12  ;;  %v1736_v14 = vld [vmem:[%s2751_s30 + $0x40] sm:$0xf]  ;;  %v1738_v15 = vld [vmem:[%s2751_s30 + $0x44] sm:$0xf] }
 0x193   : >> { %1735 = vst [vmem:[%s2747_s17 + $0x3c] sm:$0xf] %v1734_v13  ;;  %1737 = vst [vmem:[%s2747_s17 + $0x40] sm:$0xf] %v1736_v14  ;;  %v1740_v16 = vld [vmem:[%s2751_s30 + $0x48] sm:$0xf] }
 0x194   : >> { %1739 = vst [vmem:[%s2747_s17 + $0x44] sm:$0xf] %v1738_v15  ;;  %v1742_v17 = vld [vmem:[%s2751_s30 + $0x4c] sm:$0xf]  ;;  %v1744_v18 = vld [vmem:[%s2751_s30 + $0x50] sm:$0xf] }
 0x195   : >> { %1741 = vst [vmem:[%s2747_s17 + $0x48] sm:$0xf] %v1740_v16  ;;  %1743 = vst [vmem:[%s2747_s17 + $0x4c] sm:$0xf] %v1742_v17  ;;  %v1746_v19 = vld [vmem:[%s2751_s30 + $0x54] sm:$0xf] }
 0x196   : >> { %1745 = vst [vmem:[%s2747_s17 + $0x50] sm:$0xf] %v1744_v18  ;;  %v1748_v20 = vld [vmem:[%s2751_s30 + $0x58] sm:$0xf]  ;;  %v1750_v21 = vld [vmem:[%s2751_s30 + $0x5c] sm:$0xf] }
 0x197   : >> { %1747 = vst [vmem:[%s2747_s17 + $0x54] sm:$0xf] %v1746_v19  ;;  %1749 = vst [vmem:[%s2747_s17 + $0x58] sm:$0xf] %v1748_v20  ;;  %v1752_v22 = vld [vmem:[%s2751_s30 + $0x60] sm:$0xf] }
 0x198   : >> { %1751 = vst [vmem:[%s2747_s17 + $0x5c] sm:$0xf] %v1750_v21  ;;  %v1754_v23 = vld [vmem:[%s2751_s30 + $0x64] sm:$0xf]  ;;  %v1756_v24 = vld [vmem:[%s2751_s30 + $0x68] sm:$0xf] }
 0x199   : >> { %1753 = vst [vmem:[%s2747_s17 + $0x60] sm:$0xf] %v1752_v22  ;;  %1755 = vst [vmem:[%s2747_s17 + $0x64] sm:$0xf] %v1754_v23  ;;  %v1758_v25 = vld [vmem:[%s2751_s30 + $0x6c] sm:$0xf] }
 0x19a   : >> { %1757 = vst [vmem:[%s2747_s17 + $0x68] sm:$0xf] %v1756_v24  ;;  %v1760_v26 = vld [vmem:[%s2751_s30 + $0x70] sm:$0xf]  ;;  %v1762_v27 = vld [vmem:[%s2751_s30 + $0x74] sm:$0xf] }
 0x19b   : >> { %1759 = vst [vmem:[%s2747_s17 + $0x6c] sm:$0xf] %v1758_v25  ;;  %1761 = vst [vmem:[%s2747_s17 + $0x70] sm:$0xf] %v1760_v26  ;;  %v1764_v28 = vld [vmem:[%s2751_s30 + $0x78] sm:$0xf] }
 0x19c   : >> { %1763 = vst [vmem:[%s2747_s17 + $0x74] sm:$0xf] %v1762_v27  ;;  %v1766_v29 = vld [vmem:[%s2751_s30 + $0x7c] sm:$0xf]  ;;  %v1768_v30 = vld [vmem:[%s2751_s30 + $0x80] sm:$0xf] }
 0x19d   : >> { %1765 = vst [vmem:[%s2747_s17 + $0x78] sm:$0xf] %v1764_v28  ;;  %1767 = vst [vmem:[%s2747_s17 + $0x7c] sm:$0xf] %v1766_v29  ;;  %v1770_v31 = vld [vmem:[%s2751_s30 + $0x84] sm:$0xf] }
 0x19e   : >> { %1769 = vst [vmem:[%s2747_s17 + $0x80] sm:$0xf] %v1768_v30  ;;  %v1772_v32 = vld [vmem:[%s2751_s30 + $0x88] sm:$0xf]  ;;  %v1774_v33 = vld [vmem:[%s2751_s30 + $0x8c] sm:$0xf] }
 0x19f   : >> { %1771 = vst [vmem:[%s2747_s17 + $0x84] sm:$0xf] %v1770_v31  ;;  %1773 = vst [vmem:[%s2747_s17 + $0x88] sm:$0xf] %v1772_v32  ;;  %v1776_v34 = vld [vmem:[%s2751_s30 + $0x90] sm:$0xf] }
 0x1a0   : >> { %1775 = vst [vmem:[%s2747_s17 + $0x8c] sm:$0xf] %v1774_v33  ;;  %v1778_v35 = vld [vmem:[%s2751_s30 + $0x94] sm:$0xf]  ;;  %v1780_v36 = vld [vmem:[%s2751_s30 + $0x98] sm:$0xf] }
 0x1a1   : >> { %1777 = vst [vmem:[%s2747_s17 + $0x90] sm:$0xf] %v1776_v34  ;;  %1779 = vst [vmem:[%s2747_s17 + $0x94] sm:$0xf] %v1778_v35  ;;  %v1782_v37 = vld [vmem:[%s2751_s30 + $0x9c] sm:$0xf] }
 0x1a2   : >> { %1781 = vst [vmem:[%s2747_s17 + $0x98] sm:$0xf] %v1780_v36  ;;  %v1784_v38 = vld [vmem:[%s2751_s30 + $0xa0] sm:$0xf]  ;;  %v1786_v40 = vld [vmem:[%s2751_s30 + $0xa4] sm:$0xf] }
 0x1a3   : >> { %1783 = vst [vmem:[%s2747_s17 + $0x9c] sm:$0xf] %v1782_v37  ;;  %1785 = vst [vmem:[%s2747_s17 + $0xa0] sm:$0xf] %v1784_v38  ;;  %v1788_v41 = vld [vmem:[%s2751_s30 + $0xa8] sm:$0xf] }
 0x1a4   : >> { %1787 = vst [vmem:[%s2747_s17 + $0xa4] sm:$0xf] %v1786_v40  ;;  %v1790_v42 = vld [vmem:[%s2751_s30 + $0xac] sm:$0xf]  ;;  %v1792_v54 = vld [vmem:[%s2751_s30 + $0xb0] sm:$0xf] }
 0x1a5   : >> { %1789 = vst [vmem:[%s2747_s17 + $0xa8] sm:$0xf] %v1788_v41  ;;  %1791 = vst [vmem:[%s2747_s17 + $0xac] sm:$0xf] %v1790_v42  ;;  %v1794_v43 = vld [vmem:[%s2751_s30 + $0xb4] sm:$0xf] }
 0x1a6   : >> { %1793 = vst [vmem:[%s2747_s17 + $0xb0] sm:$0xf] %v1792_v54  ;;  %v1796_v44 = vld [vmem:[%s2751_s30 + $0xb8] sm:$0xf]  ;;  %v1798_v46 = vld [vmem:[%s2751_s30 + $0xbc] sm:$0xf] }
 0x1a7   : >> { %1795 = vst [vmem:[%s2747_s17 + $0xb4] sm:$0xf] %v1794_v43  ;;  %1797 = vst [vmem:[%s2747_s17 + $0xb8] sm:$0xf] %v1796_v44  ;;  %v1800_v47 = vld [vmem:[%s2751_s30 + $0xc0] sm:$0xf] }
 0x1a8   : >> { %1799 = vst [vmem:[%s2747_s17 + $0xbc] sm:$0xf] %v1798_v46  ;;  %v1802_v48 = vld [vmem:[%s2751_s30 + $0xc4] sm:$0xf]  ;;  %v1804_v49 = vld [vmem:[%s2751_s30 + $0xc8] sm:$0xf] }
 0x1a9   : >> { %1801 = vst [vmem:[%s2747_s17 + $0xc0] sm:$0xf] %v1800_v47  ;;  %1803 = vst [vmem:[%s2747_s17 + $0xc4] sm:$0xf] %v1802_v48  ;;  %v1806_v50 = vld [vmem:[%s2751_s30 + $0xcc] sm:$0xf] }
 0x1aa   : >> { %1805 = vst [vmem:[%s2747_s17 + $0xc8] sm:$0xf] %v1804_v49  ;;  %v1808_v51 = vld [vmem:[%s2751_s30 + $0xd0] sm:$0xf]  ;;  %v1810_v52 = vld [vmem:[%s2751_s30 + $0xd4] sm:$0xf] }
 0x1ab   : >> { %1807 = vst [vmem:[%s2747_s17 + $0xcc] sm:$0xf] %v1806_v50  ;;  %1809 = vst [vmem:[%s2747_s17 + $0xd0] sm:$0xf] %v1808_v51  ;;  %v1812_v53 = vld [vmem:[%s2751_s30 + $0xd8] sm:$0xf] }
 0x1ac   : >> { %1811 = vst [vmem:[%s2747_s17 + $0xd4] sm:$0xf] %v1810_v52  ;;  %v1814_v55 = vld [vmem:[%s2751_s30 + $0xdc] sm:$0xf]  ;;  %v1816_v62 = vld [vmem:[%s2751_s30 + $0xe0] sm:$0xf] }
 0x1ad   : >> { %1813 = vst [vmem:[%s2747_s17 + $0xd8] sm:$0xf] %v1812_v53  ;;  %1815 = vst [vmem:[%s2747_s17 + $0xdc] sm:$0xf] %v1814_v55  ;;  %v1818_v56 = vld [vmem:[%s2751_s30 + $0xe4] sm:$0xf] }
 0x1ae   : >> { %1817 = vst [vmem:[%s2747_s17 + $0xe0] sm:$0xf] %v1816_v62  ;;  %1819 = vst [vmem:[%s2747_s17 + $0xe4] sm:$0xf] %v1818_v56  ;;  %s3626_s11 = smov (%p1821_p12, %s1820_s11), 0  ;;  %s1698_s10 = sadd.s32 1, %s2759_s10  }
 0x1af   : >> { %s1823_s12 = smul.u32 232, %s3626_s11  ;;  %p1697_p13 = scmp.ge.s32.totalorder %s1698_s10, %s3434_s23 }
 0x1b0   : >> { %s3616_s9 = smov %s3626_s11 }
 0x1b1   : >> { %s1825_s30 = scalar_lea.vmem %s3135_s20, %s1823_s12 [#allocation3]   ;;  %s1826_s17 = scalar_lea.vmem %s3428_s7, %s1823_s12  }
 0x1b2   : > { %1700 = sbr.rel (!%p1697_p13) target bundleno = 392 (0x188), region = 139 }
 0x1b9 PF: > { %2671 = sdivrem.u32 %s3624_s28, 58 }
 0x1ba   : > { %s2306_s13 = smul.u32 232, %s3434_s23 }
 0x1bc   : > { %s1831_s14 = scalar_lea.vmem %s3135_s20, %s2306_s13 [#allocation3]   ;;  %s1833_s15 = scalar_lea.vmem %s3428_s7, %s2306_s13  }
 0x1c2   : > { %s2672_s22 = spop.drf %2671 }
 0x1c3   : > { %p2308_p0 = scmp.le.s32.totalorder %s2672_s22, 0 }
 0x1c4   : > { %s2761_s24 = smov (!%p2308_p0), %s1833_s15   ;;  %s2765_s26 = smov (!%p2308_p0), %s1831_s14  }
 0x1c5   : > { %2104 = sbr.rel (%p2308_p0) target bundleno = 470 (0x1d6), region = 144  ;;  %s2769_s27 = smov (!%p2308_p0), 0  }
 0x1c6   : > { %s2773_s29 = smov (!%p2308_p0), 0  }
 0x1cc LB: >> { %v1843_v57 = vld [vmem:[%s2767_s26] sm:$0xf]  ;;  %s1845_s5 = sadd.s32 1, %s2771_s27  ;;  %s1837_s29 = sadd.s32 1, %s2775_s29   ;;  %s2775_s29 = sphi %s2773_s29, %s1837_s29   ;;  %s2771_s27 = sphi %s2769_s27, %s2770_s27   ;;  %s2767_s26 = sphi %s2765_s26, %s1850_s26   ;;  %s2763_s24 = sphi %s2761_s24, %s1851_s24  }
 0x1cd   : >> { %1844 = vst [vmem:[%s2763_s24] sm:$0xf] %v1843_v57  ;;  %p1846_p1 = scmp.ge.s32.totalorder %s1845_s5, %s2672_s22  ;;  %p1836_p2 = scmp.ge.s32.totalorder %s1837_s29, %s2672_s22 }
 0x1cf   : >> { %s3628_s5 = smov (%p1846_p1, %s1845_s5), 0  ;;  %1839 = sbr.rel (!%p1836_p2) target bundleno = 460 (0x1cc), region = 150 }
 0x1d0   : >> { %s2309_s20 = sshll.u32 %s3628_s5, 2  ;;  %s2770_s27 = smov %s3628_s5  }
 0x1d1   : >> { %s1850_s26 = scalar_lea.vmem %s1831_s14, %s2309_s20 [#allocation3]   ;;  %s1851_s24 = scalar_lea.vmem %s1833_s15, %s2309_s20  }
 0x1d6 PF: > { %s14_s19 = sadd.s32 1, %s2743_s19   ;;  %s3617_s15 = smov %s2731_s16 }
 0x1d7   : > { %p11_p3 = scmp.ge.s32.totalorder %s14_s19, 8   ;;  %s3618_s16 = smov %s2846_s25 }
 0x1d8   : > { %s3619_s17 = smov %s2739_s18  ;;  %s3620_s18 = smov %s3622_s21 }
 0x1d9   :  { %13 = sbr.rel (!%p11_p3) target bundleno = 3 (0x3), region = 161 }

</bundles_post_ra>
